<compile_context>
chip_gen: v6e
topology: v6e:2x2x1
jax: 0.10.0
libtpu: 0.0.40
codegen_flags: <defaults>
</compile_context>

<pallas_src>
import jax
import jax.numpy as jnp
from jax import lax
from jax.experimental import pallas as pl
from jax.experimental.pallas import tpu as pltpu

_SUBLANES = 8
_LANES = 128


def _vmem_config():
    """Generation-aware VMEM budget (v5e/v6e: 128 MiB physical, v7x: 64 MiB)."""
    try:
        cap = pltpu.get_tpu_info().vmem_capacity_bytes
    except Exception:
        cap = 64 * 1024 * 1024
    vmem_limit = int(min(96 * 1024 * 1024, cap * 3 // 4))
    budget = max(12 * 1024 * 1024, vmem_limit // 2 - 4 * 1024 * 1024)
    return budget, vmem_limit


def _choose_block_rows(hwr, n_classes, score_bytes, budget_bytes):
    """Rows (of 128 lanes) per grid step for the (C, bm, 128) slab."""
    # Double-buffered score + label streams plus the exp slab and a handful of
    # (bm, 128) f32 temporaries.
    per_row = _LANES * (2 * n_classes * score_bytes + 8 + 2 * n_classes * 4 + 32)
    cap = max(8, min(1024, budget_bytes // per_row))
    cap = max(8, (cap // 8) * 8)
    if hwr <= cap:
        return hwr                       # single full-extent block (layout-legal)
    # Prefer a multiple of 8 that divides hwr so there is no ragged tail block.
    for cand in range(cap, max(8, cap // 2) - 1, -8):
        if hwr % cand == 0:
            return cand
    return cap


def _make_dice_kernel(n_classes, apply_softmax, bm, hw, m_per_split,
                      mask_full, mask_pad):
    def kernel(score_ref, label_ref, acc_ref):
        @pl.when(pl.program_id(2) == 0)
        def _():
            acc_ref[...] = jnp.zeros_like(acc_ref)

        s = score_ref[0].astype(jnp.float32)        # (C, bm, 128)
        lab = label_ref[0]                          # (bm, 128) int8/int32

        valid = None
        if mask_full:
            # Ragged last block / clamped split block: rows past the true
            # extent hold unspecified VMEM contents -> positional mask + clamp
            # so exp/square below stay finite.
            mb = pl.program_id(0) * m_per_split + pl.program_id(2)
            row = lax.broadcasted_iota(jnp.int32, (bm, _LANES), 0)
            col = lax.broadcasted_iota(jnp.int32, (bm, _LANES), 1)
            valid = (mb * bm + row) * _LANES + col < hw
            s = jnp.where(valid[None], s, 0.0)
        elif mask_pad and apply_softmax:
            valid = lab >= 0                        # wrapper-padded tail (-1 labels)

        if apply_softmax:
            smax = jnp.max(s, axis=0, keepdims=True)
            e = jnp.exp(s - smax)                   # (C, bm, 128), never normalized
            inv = pl.reciprocal(jnp.sum(e, axis=0), approx=False)
            if valid is not None:
                inv = jnp.where(valid, inv, 0.0)    # one mask, not one per class
            # (approx=True would move this fully onto the EUP on v7x at ~1e-6
            # relative drift; kept exact for parity with the reference.)
        else:
            e = s
            inv = None

        # (8, bm) 0/1 selector: row i picks source rows r with r % 8 == i, so a
        # single MXU matmul yields an exact (8, 128) partial column sum.
        sel = (lax.broadcasted_iota(jnp.int32, (_SUBLANES, bm), 1) % _SUBLANES ==
               lax.broadcasted_iota(jnp.int32, (_SUBLANES, bm), 0)
               ).astype(jnp.float32)

        def psum(x):   # (bm, 128) -> (8, 128) partial sum on the idle MXU
            return jnp.dot(sel, x, precision=lax.Precision.HIGHEST,
                           preferred_element_type=jnp.float32)

        for c in range(n_classes):                  # small static unroll
            sc = e[c] * inv if apply_softmax else e[c]          # (bm, 128)
            cls = lab == c
            if mask_full:
                cls = jnp.logical_and(cls, valid)
            acc_ref[0, c] += psum(jnp.where(cls, sc, 0.0))                 # inter
            acc_ref[0, n_classes + c] += psum(sc * sc)                     # sum s^2
            acc_ref[0, 2 * n_classes + c] += psum(jnp.where(cls, 1.0, 0.0))  # sum t

    return kernel


def dice_loss(inputs, target, weight=None, softmax=False, max_block_rows=None):
    """inputs: (N, C, H, W) float scores; target: (N, 1, H, W) int class labels."""
    N, C, H, W = inputs.shape
    if weight is None:
        weight = [1.0] * C
    weight = jnp.asarray(weight, jnp.float32)

    HW = H * W
    hwr = -(-HW // _LANES)                 # number of 128-lane rows
    pad = hwr * _LANES - HW

    budget, vmem_limit = _vmem_config()
    bm = _choose_block_rows(hwr, C, inputs.dtype.itemsize, budget)
    if max_block_rows is not None and max_block_rows < bm:   # test/tuning knob
        bm = max(8, (max_block_rows // 8) * 8)
    grid_m = -(-hwr // bm)

    # Split the spatial block range across two per-batch accumulators when the
    # batch axis alone cannot feed both v7x TensorCores; harmless elsewhere.
    n_splits = 2 if (N == 1 and grid_m >= 2) else 1
    m_per_split = -(-grid_m // n_splits)

    partial_tail = (hwr % bm) != 0
    split_overhang = n_splits * m_per_split != grid_m
    mask_full = partial_tail or split_overhang
    mask_pad = (pad != 0) and not mask_full

    # Scores: free (N, C, HW) view; copy only when HW has a ragged 128-tail.
    score = inputs.reshape(N, C, HW)
    if pad:
        score = jnp.pad(score, ((0, 0), (0, 0), (0, pad)))
    score = score.reshape(N, C, hwr, _LANES)

    # Labels: int8 stream when the tile shape allows it; -1 marks padding.
    use_int8 = (bm % 32 == 0) and (hwr % bm == 0) and C < 128
    labels = target.reshape(N, HW).astype(jnp.int8 if use_int8 else jnp.int32)
    if pad:
        labels = jnp.pad(labels, ((0, 0), (0, pad)), constant_values=-1)
    labels = labels.reshape(N, hwr, _LANES)

    def score_map(s, n, m):
        return (n, 0, jnp.minimum(s * m_per_split + m, grid_m - 1), 0)

    def label_map(s, n, m):
        return (n, jnp.minimum(s * m_per_split + m, grid_m - 1), 0)

    def acc_map(s, n, m):
        return (s * N + n, 0, 0, 0)

    kernel = _make_dice_kernel(C, bool(softmax), bm, HW, m_per_split,
                               mask_full, mask_pad)
    acc = pl.pallas_call(
        kernel,
        out_shape=jax.ShapeDtypeStruct(
            (n_splits * N, 3 * C, _SUBLANES, _LANES), jnp.float32),
        grid_spec=pltpu.PrefetchScalarGridSpec(
            num_scalar_prefetch=0,
            grid=(n_splits, N, m_per_split),
            in_specs=[
                pl.BlockSpec((1, C, bm, _LANES), score_map),
                pl.BlockSpec((1, bm, _LANES), label_map),
            ],
            out_specs=pl.BlockSpec((1, 3 * C, _SUBLANES, _LANES), acc_map),
        ),
        compiler_params=pltpu.CompilerParams(
            dimension_semantics=("parallel", "parallel", "arbitrary"),
            vmem_limit_bytes=vmem_limit,
        ),
    )(score, labels)

    # Tiny final reduction of the per-(split, batch), per-class (8,128) partials.
    totals = acc.sum(axis=(0, 2, 3))                  # (3*C,)
    inter, s2, tsum = totals[:C], totals[C:2 * C], totals[2 * C:]

    smooth = 1e-10
    dice = 1.0 - inter / (s2 + tsum + smooth)         # per-class dice loss
    return jnp.sum(dice * weight) / C


def dice_loss_ref(inputs, target, weight=None, softmax=False):
    """Pure-JAX reference mirroring the PyTorch module."""
    N, C, H, W = inputs.shape
    if softmax:
        inputs = jax.nn.softmax(inputs, axis=1)
    if weight is None:
        weight = [1.0] * C
    onehot = (target.reshape(N, H, W)[..., None] == jnp.arange(C)).astype(jnp.float32)
    onehot = jnp.transpose(onehot, (0, 3, 1, 2))      # (N, C, H, W)
    smooth = 1e-10
    loss = 0.0
    for i in range(C):
        s = inputs[:, i].astype(jnp.float32)
        t = onehot[:, i]
        inter = jnp.sum(s * t)
        union = jnp.sum(s * s) + jnp.sum(t * t) + smooth
        loss = loss + (1.0 - inter / union) * weight[i]
    return loss / C


if __name__ == "__main__":
    key = jax.random.PRNGKey(0)

    def run_case(idx, N, C, H, W, softmax, weight=None, max_block_rows=None,
                 probs=False):
        ki, kt = jax.random.split(jax.random.fold_in(key, idx))
        x = jax.random.normal(ki, (N, C, H, W), dtype=jnp.float32)
        if probs:
            x = jax.nn.sigmoid(x)
        t = jax.random.randint(kt, (N, 1, H, W), 0, C, dtype=jnp.int32)
        got = jax.block_until_ready(
            dice_loss(x, t, weight=weight, softmax=softmax,
                      max_block_rows=max_block_rows))
        ref = jax.block_until_ready(
            dice_loss_ref(x, t, weight=weight, softmax=softmax))
        assert jnp.allclose(got, ref, rtol=1e-4, atol=1e-5), (idx, got, ref)

    # 0) small, fused-softmax path, single tiny full-extent block
    run_case(0, 2, 4, 16, 16, softmax=True)
    # 1) raw-probability path with per-class weights
    run_case(1, 2, 4, 16, 16, softmax=False, weight=[0.5, 1.0, 1.5, 2.0], probs=True)
    # 2) multi-step grid, int8 label stream, no masking (HW % 128 == 0, bm | hwr)
    run_case(2, 2, 3, 64, 128, softmax=True, max_block_rows=32)
    # 3) N==1 core-split + ragged last block (positional mask + index clamp)
    run_case(3, 1, 2, 48, 48, softmax=True, max_block_rows=8)
    # 4) ragged HW%128 tail, raw-probability path (wrapper pad, no in-kernel mask)
    run_case(4, 2, 4, 30, 30, softmax=False, probs=True)
    # 5) ragged HW%128 tail, fused softmax (mask folded into the reciprocal)
    run_case(5, 2, 4, 30, 30, softmax=True)

    print("KERNEL_OK")
</pallas_src>

<mosaic_0001>
module attributes {stable_mosaic.version = 11 : i64} {
  func.func @kernel(%arg0: i32, %arg1: i32, %arg2: i32, %arg3: memref<1x4x2x128xf32, #tpu.memory_space<vmem>>, %arg4: memref<1x2x128xi32, #tpu.memory_space<vmem>>, %arg5: memref<1x12x8x128xf32, #tpu.memory_space<vmem>>) attributes {dimension_semantics = [#tpu.dimension_semantics<parallel>, #tpu.dimension_semantics<parallel>, #tpu.dimension_semantics<arbitrary>], iteration_bounds = array<i64: 1, 2, 1>, scalar_prefetch = 0 : i64, scratch_operands = 0 : i64, tpu.core_type = #tpu.core_type<tc>, window_params = [{transform_indices = @transform_0, window_bounds = array<i64: 1, 4, 2, 128>}, {transform_indices = @transform_1, window_bounds = array<i64: 1, 2, 128>}, {transform_indices = @transform_2, window_bounds = array<i64: 1, 12, 8, 128>}]} {
    %c0_i32 = arith.constant 0 : i32
    %0 = arith.cmpi eq, %arg2, %c0_i32 : i32
    %1 = arith.extui %0 : i1 to i32
    %c0_i32_0 = arith.constant 0 : i32
    %2 = arith.cmpi ne, %1, %c0_i32_0 : i32
    scf.if %2 {
      %cst_123 = arith.constant 0.000000e+00 : f32
      %163 = vector.broadcast %cst_123 : f32 to vector<1x12x8x128xf32>
      %c0_124 = arith.constant 0 : index
      %c0_125 = arith.constant 0 : index
      %c0_126 = arith.constant 0 : index
      %c0_127 = arith.constant 0 : index
      %164 = vector.load %arg5[%c0_124, %c0_125, %c0_126, %c0_127] : memref<1x12x8x128xf32, #tpu.memory_space<vmem>>, vector<1x12x8x128xf32>
      tpu.vector_store %arg5[%c0_124, %c0_125, %c0_126, %c0_127], %163 {strides = array<i32>} : memref<1x12x8x128xf32, #tpu.memory_space<vmem>>, vector<1x12x8x128xf32>,
    } else {
    }
    %c0 = arith.constant 0 : index
    %c0_1 = arith.constant 0 : index
    %c0_2 = arith.constant 0 : index
    %c0_3 = arith.constant 0 : index
    %3 = vector.load %arg3[%c0, %c0_1, %c0_2, %c0_3] : memref<1x4x2x128xf32, #tpu.memory_space<vmem>>, vector<1x4x2x128xf32>
    %4 = vector.shape_cast %3 : vector<1x4x2x128xf32> to vector<4x2x128xf32>
    %c0_4 = arith.constant 0 : index
    %c0_5 = arith.constant 0 : index
    %c0_6 = arith.constant 0 : index
    %5 = vector.load %arg4[%c0_4, %c0_5, %c0_6] : memref<1x2x128xi32, #tpu.memory_space<vmem>>, vector<1x2x128xi32>
    %6 = vector.shape_cast %5 : vector<1x2x128xi32> to vector<2x128xi32>
    %cst = arith.constant dense<0xFF800000> : vector<2x128xf32>
    %7 = vector.multi_reduction <maximumf>, %4, %cst [0] : vector<4x2x128xf32> to vector<2x128xf32>
    %8 = vector.shape_cast %7 : vector<2x128xf32> to vector<1x2x128xf32>
    %9 = vector.broadcast %8 : vector<1x2x128xf32> to vector<4x2x128xf32>
    %10 = arith.subf %4, %9 : vector<4x2x128xf32>
    %11 = math.exp %10 : vector<4x2x128xf32>
    %cst_7 = arith.constant dense<0.000000e+00> : vector<2x128xf32>
    %12 = vector.multi_reduction <add>, %11, %cst_7 [0] : vector<4x2x128xf32> to vector<2x128xf32>
    %13 = tpu.reciprocal %12 : vector<2x128xf32> -> vector<2x128xf32>
    %14 = tpu.iota {dimensions = array<i32: 1>} : vector<8x2xi32>
    %c8_i32 = arith.constant 8 : i32
    %c0_i32_8 = arith.constant 0 : i32
    %15 = arith.cmpi eq, %c8_i32, %c0_i32_8 : i32
    %c1_i32 = arith.constant 1 : i32
    %16 = arith.select %15, %c1_i32, %c8_i32 : i32
    %17 = vector.broadcast %16 : i32 to vector<8x2xi32>
    %18 = arith.remsi %14, %17 : vector<8x2xi32>
    %c0_i32_9 = arith.constant 0 : i32
    %19 = vector.broadcast %c0_i32_9 : i32 to vector<8x2xi32>
    %20 = arith.cmpi ne, %18, %19 : vector<8x2xi32>
    %c0_i32_10 = arith.constant 0 : i32
    %21 = vector.broadcast %c0_i32_10 : i32 to vector<8x2xi32>
    %22 = arith.cmpi slt, %18, %21 : vector<8x2xi32>
    %c0_i32_11 = arith.constant 0 : i32
    %23 = arith.cmpi slt, %16, %c0_i32_11 : i32
    %24 = vector.broadcast %23 : i1 to vector<8x2xi1>
    %25 = vector.broadcast %24 : vector<8x2xi1> to vector<8x2xi1>
    %26 = arith.xori %22, %25 : vector<8x2xi1>
    %27 = arith.andi %26, %20 : vector<8x2xi1>
    %28 = vector.broadcast %16 : i32 to vector<8x2xi32>
    %29 = arith.addi %18, %28 : vector<8x2xi32>
    %30 = arith.select %27, %29, %18 : vector<8x2xi1>, vector<8x2xi32>
    %31 = tpu.iota {dimensions = array<i32: 0>} : vector<8x2xi32>
    %32 = arith.cmpi eq, %30, %31 : vector<8x2xi32>
    %33 = arith.extui %32 : vector<8x2xi1> to vector<8x2xi32>
    %34 = arith.sitofp %33 : vector<8x2xi32> to vector<8x2xf32>
    %35 = vector.extract_strided_slice %11 {offsets = [0, 0, 0], sizes = [1, 2, 128], strides = [1, 1, 1]} : vector<4x2x128xf32> to vector<1x2x128xf32>
    %36 = vector.shape_cast %35 : vector<1x2x128xf32> to vector<2x128xf32>
    %37 = arith.mulf %36, %13 : vector<2x128xf32>
    %c0_i32_12 = arith.constant 0 : i32
    %38 = vector.broadcast %c0_i32_12 : i32 to vector<2x128xi32>
    %39 = arith.cmpi eq, %6, %38 : vector<2x128xi32>
    %c0_13 = arith.constant 0 : index
    %c0_14 = arith.constant 0 : index
    %c0_15 = arith.constant 0 : index
    %c0_16 = arith.constant 0 : index
    %40 = vector.load %arg5[%c0_13, %c0_14, %c0_15, %c0_16] : memref<1x12x8x128xf32, #tpu.memory_space<vmem>>, vector<1x1x8x128xf32>
    %41 = vector.shape_cast %40 : vector<1x1x8x128xf32> to vector<8x128xf32>
    %cst_17 = arith.constant 0.000000e+00 : f32
    %42 = vector.broadcast %cst_17 : f32 to vector<2x128xf32>
    %43 = arith.select %39, %37, %42 : vector<2x128xi1>, vector<2x128xf32>
    %cst_18 = arith.constant dense<0.000000e+00> : vector<8x128xf32>
    %44 = tpu.matmul %34, %43, %cst_18 {dimension_numbers = #tpu.dot_dimension_numbers<[1], [0], [0], [1], [0, 0, 1, 1], [], []>, precision = #tpu.contract_precision<fp32>} : vector<8x2xf32>, vector<2x128xf32>, vector<8x128xf32> -> vector<8x128xf32>
    %45 = arith.addf %41, %44 : vector<8x128xf32>
    %c0_19 = arith.constant 0 : index
    %c0_20 = arith.constant 0 : index
    %c0_21 = arith.constant 0 : index
    %c0_22 = arith.constant 0 : index
    %46 = vector.load %arg5[%c0_19, %c0_20, %c0_21, %c0_22] : memref<1x12x8x128xf32, #tpu.memory_space<vmem>>, vector<1x1x8x128xf32>
    %47 = vector.shape_cast %46 : vector<1x1x8x128xf32> to vector<8x128xf32>
    %48 = vector.shape_cast %45 : vector<8x128xf32> to vector<1x1x8x128xf32>
    tpu.vector_store %arg5[%c0_19, %c0_20, %c0_21, %c0_22], %48 {strides = array<i32>} : memref<1x12x8x128xf32, #tpu.memory_space<vmem>>, vector<1x1x8x128xf32>,
    %c0_23 = arith.constant 0 : index
    %c4 = arith.constant 4 : index
    %c0_24 = arith.constant 0 : index
    %c0_25 = arith.constant 0 : index
    %49 = vector.load %arg5[%c0_23, %c4, %c0_24, %c0_25] : memref<1x12x8x128xf32, #tpu.memory_space<vmem>>, vector<1x1x8x128xf32>
    %50 = vector.shape_cast %49 : vector<1x1x8x128xf32> to vector<8x128xf32>
    %51 = arith.mulf %37, %37 : vector<2x128xf32>
    %cst_26 = arith.constant dense<0.000000e+00> : vector<8x128xf32>
    %52 = tpu.matmul %34, %51, %cst_26 {dimension_numbers = #tpu.dot_dimension_numbers<[1], [0], [0], [1], [0, 0, 1, 1], [], []>, precision = #tpu.contract_precision<fp32>} : vector<8x2xf32>, vector<2x128xf32>, vector<8x128xf32> -> vector<8x128xf32>
    %53 = arith.addf %50, %52 : vector<8x128xf32>
    %c0_27 = arith.constant 0 : index
    %c4_28 = arith.constant 4 : index
    %c0_29 = arith.constant 0 : index
    %c0_30 = arith.constant 0 : index
    %54 = vector.load %arg5[%c0_27, %c4_28, %c0_29, %c0_30] : memref<1x12x8x128xf32, #tpu.memory_space<vmem>>, vector<1x1x8x128xf32>
    %55 = vector.shape_cast %54 : vector<1x1x8x128xf32> to vector<8x128xf32>
    %56 = vector.shape_cast %53 : vector<8x128xf32> to vector<1x1x8x128xf32>
    tpu.vector_store %arg5[%c0_27, %c4_28, %c0_29, %c0_30], %56 {strides = array<i32>} : memref<1x12x8x128xf32, #tpu.memory_space<vmem>>, vector<1x1x8x128xf32>,
    %c0_31 = arith.constant 0 : index
    %c8 = arith.constant 8 : index
    %c0_32 = arith.constant 0 : index
    %c0_33 = arith.constant 0 : index
    %57 = vector.load %arg5[%c0_31, %c8, %c0_32, %c0_33] : memref<1x12x8x128xf32, #tpu.memory_space<vmem>>, vector<1x1x8x128xf32>
    %58 = vector.shape_cast %57 : vector<1x1x8x128xf32> to vector<8x128xf32>
    %cst_34 = arith.constant 1.000000e+00 : f32
    %cst_35 = arith.constant 0.000000e+00 : f32
    %59 = vector.broadcast %cst_34 : f32 to vector<2x128xf32>
    %60 = vector.broadcast %cst_35 : f32 to vector<2x128xf32>
    %61 = arith.select %39, %59, %60 : vector<2x128xi1>, vector<2x128xf32>
    %cst_36 = arith.constant dense<0.000000e+00> : vector<8x128xf32>
    %62 = tpu.matmul %34, %61, %cst_36 {dimension_numbers = #tpu.dot_dimension_numbers<[1], [0], [0], [1], [0, 0, 1, 1], [], []>, precision = #tpu.contract_precision<fp32>} : vector<8x2xf32>, vector<2x128xf32>, vector<8x128xf32> -> vector<8x128xf32>
    %63 = arith.addf %58, %62 : vector<8x128xf32>
    %c0_37 = arith.constant 0 : index
    %c8_38 = arith.constant 8 : index
    %c0_39 = arith.constant 0 : index
    %c0_40 = arith.constant 0 : index
    %64 = vector.load %arg5[%c0_37, %c8_38, %c0_39, %c0_40] : memref<1x12x8x128xf32, #tpu.memory_space<vmem>>, vector<1x1x8x128xf32>
    %65 = vector.shape_cast %64 : vector<1x1x8x128xf32> to vector<8x128xf32>
    %66 = vector.shape_cast %63 : vector<8x128xf32> to vector<1x1x8x128xf32>
    tpu.vector_store %arg5[%c0_37, %c8_38, %c0_39, %c0_40], %66 {strides = array<i32>} : memref<1x12x8x128xf32, #tpu.memory_space<vmem>>, vector<1x1x8x128xf32>,
    %67 = vector.extract_strided_slice %11 {offsets = [1, 0, 0], sizes = [1, 2, 128], strides = [1, 1, 1]} : vector<4x2x128xf32> to vector<1x2x128xf32>
    %68 = vector.shape_cast %67 : vector<1x2x128xf32> to vector<2x128xf32>
    %69 = arith.mulf %68, %13 : vector<2x128xf32>
    %c1_i32_41 = arith.constant 1 : i32
    %70 = vector.broadcast %c1_i32_41 : i32 to vector<2x128xi32>
    %71 = arith.cmpi eq, %6, %70 : vector<2x128xi32>
    %c0_42 = arith.constant 0 : index
    %c1 = arith.constant 1 : index
    %c0_43 = arith.constant 0 : index
    %c0_44 = arith.constant 0 : index
    %72 = vector.load %arg5[%c0_42, %c1, %c0_43, %c0_44] : memref<1x12x8x128xf32, #tpu.memory_space<vmem>>, vector<1x1x8x128xf32>
    %73 = vector.shape_cast %72 : vector<1x1x8x128xf32> to vector<8x128xf32>
    %cst_45 = arith.constant 0.000000e+00 : f32
    %74 = vector.broadcast %cst_45 : f32 to vector<2x128xf32>
    %75 = arith.select %71, %69, %74 : vector<2x128xi1>, vector<2x128xf32>
    %cst_46 = arith.constant dense<0.000000e+00> : vector<8x128xf32>
    %76 = tpu.matmul %34, %75, %cst_46 {dimension_numbers = #tpu.dot_dimension_numbers<[1], [0], [0], [1], [0, 0, 1, 1], [], []>, precision = #tpu.contract_precision<fp32>} : vector<8x2xf32>, vector<2x128xf32>, vector<8x128xf32> -> vector<8x128xf32>
    %77 = arith.addf %73, %76 : vector<8x128xf32>
    %c0_47 = arith.constant 0 : index
    %c1_48 = arith.constant 1 : index
    %c0_49 = arith.constant 0 : index
    %c0_50 = arith.constant 0 : index
    %78 = vector.load %arg5[%c0_47, %c1_48, %c0_49, %c0_50] : memref<1x12x8x128xf32, #tpu.memory_space<vmem>>, vector<1x1x8x128xf32>
    %79 = vector.shape_cast %78 : vector<1x1x8x128xf32> to vector<8x128xf32>
    %80 = vector.shape_cast %77 : vector<8x128xf32> to vector<1x1x8x128xf32>
    tpu.vector_store %arg5[%c0_47, %c1_48, %c0_49, %c0_50], %80 {strides = array<i32>} : memref<1x12x8x128xf32, #tpu.memory_space<vmem>>, vector<1x1x8x128xf32>,
    %c0_51 = arith.constant 0 : index
    %c5 = arith.constant 5 : index
    %c0_52 = arith.constant 0 : index
    %c0_53 = arith.constant 0 : index
    %81 = vector.load %arg5[%c0_51, %c5, %c0_52, %c0_53] : memref<1x12x8x128xf32, #tpu.memory_space<vmem>>, vector<1x1x8x128xf32>
    %82 = vector.shape_cast %81 : vector<1x1x8x128xf32> to vector<8x128xf32>
    %83 = arith.mulf %69, %69 : vector<2x128xf32>
    %cst_54 = arith.constant dense<0.000000e+00> : vector<8x128xf32>
    %84 = tpu.matmul %34, %83, %cst_54 {dimension_numbers = #tpu.dot_dimension_numbers<[1], [0], [0], [1], [0, 0, 1, 1], [], []>, precision = #tpu.contract_precision<fp32>} : vector<8x2xf32>, vector<2x128xf32>, vector<8x128xf32> -> vector<8x128xf32>
    %85 = arith.addf %82, %84 : vector<8x128xf32>
    %c0_55 = arith.constant 0 : index
    %c5_56 = arith.constant 5 : index
    %c0_57 = arith.constant 0 : index
    %c0_58 = arith.constant 0 : index
    %86 = vector.load %arg5[%c0_55, %c5_56, %c0_57, %c0_58] : memref<1x12x8x128xf32, #tpu.memory_space<vmem>>, vector<1x1x8x128xf32>
    %87 = vector.shape_cast %86 : vector<1x1x8x128xf32> to vector<8x128xf32>
    %88 = vector.shape_cast %85 : vector<8x128xf32> to vector<1x1x8x128xf32>
    tpu.vector_store %arg5[%c0_55, %c5_56, %c0_57, %c0_58], %88 {strides = array<i32>} : memref<1x12x8x128xf32, #tpu.memory_space<vmem>>, vector<1x1x8x128xf32>,
    %c0_59 = arith.constant 0 : index
    %c9 = arith.constant 9 : index
    %c0_60 = arith.constant 0 : index
    %c0_61 = arith.constant 0 : index
    %89 = vector.load %arg5[%c0_59, %c9, %c0_60, %c0_61] : memref<1x12x8x128xf32, #tpu.memory_space<vmem>>, vector<1x1x8x128xf32>
    %90 = vector.shape_cast %89 : vector<1x1x8x128xf32> to vector<8x128xf32>
    %cst_62 = arith.constant 1.000000e+00 : f32
    %cst_63 = arith.constant 0.000000e+00 : f32
    %91 = vector.broadcast %cst_62 : f32 to vector<2x128xf32>
    %92 = vector.broadcast %cst_63 : f32 to vector<2x128xf32>
    %93 = arith.select %71, %91, %92 : vector<2x128xi1>, vector<2x128xf32>
    %cst_64 = arith.constant dense<0.000000e+00> : vector<8x128xf32>
    %94 = tpu.matmul %34, %93, %cst_64 {dimension_numbers = #tpu.dot_dimension_numbers<[1], [0], [0], [1], [0, 0, 1, 1], [], []>, precision = #tpu.contract_precision<fp32>} : vector<8x2xf32>, vector<2x128xf32>, vector<8x128xf32> -> vector<8x128xf32>
    %95 = arith.addf %90, %94 : vector<8x128xf32>
    %c0_65 = arith.constant 0 : index
    %c9_66 = arith.constant 9 : index
    %c0_67 = arith.constant 0 : index
    %c0_68 = arith.constant 0 : index
    %96 = vector.load %arg5[%c0_65, %c9_66, %c0_67, %c0_68] : memref<1x12x8x128xf32, #tpu.memory_space<vmem>>, vector<1x1x8x128xf32>
    %97 = vector.shape_cast %96 : vector<1x1x8x128xf32> to vector<8x128xf32>
    %98 = vector.shape_cast %95 : vector<8x128xf32> to vector<1x1x8x128xf32>
    tpu.vector_store %arg5[%c0_65, %c9_66, %c0_67, %c0_68], %98 {strides = array<i32>} : memref<1x12x8x128xf32, #tpu.memory_space<vmem>>, vector<1x1x8x128xf32>,
    %99 = vector.extract_strided_slice %11 {offsets = [2, 0, 0], sizes = [1, 2, 128], strides = [1, 1, 1]} : vector<4x2x128xf32> to vector<1x2x128xf32>
    %100 = vector.shape_cast %99 : vector<1x2x128xf32> to vector<2x128xf32>
    %101 = arith.mulf %100, %13 : vector<2x128xf32>
    %c2_i32 = arith.constant 2 : i32
    %102 = vector.broadcast %c2_i32 : i32 to vector<2x128xi32>
    %103 = arith.cmpi eq, %6, %102 : vector<2x128xi32>
    %c0_69 = arith.constant 0 : index
    %c2 = arith.constant 2 : index
    %c0_70 = arith.constant 0 : index
    %c0_71 = arith.constant 0 : index
    %104 = vector.load %arg5[%c0_69, %c2, %c0_70, %c0_71] : memref<1x12x8x128xf32, #tpu.memory_space<vmem>>, vector<1x1x8x128xf32>
    %105 = vector.shape_cast %104 : vector<1x1x8x128xf32> to vector<8x128xf32>
    %cst_72 = arith.constant 0.000000e+00 : f32
    %106 = vector.broadcast %cst_72 : f32 to vector<2x128xf32>
    %107 = arith.select %103, %101, %106 : vector<2x128xi1>, vector<2x128xf32>
    %cst_73 = arith.constant dense<0.000000e+00> : vector<8x128xf32>
    %108 = tpu.matmul %34, %107, %cst_73 {dimension_numbers = #tpu.dot_dimension_numbers<[1], [0], [0], [1], [0, 0, 1, 1], [], []>, precision = #tpu.contract_precision<fp32>} : vector<8x2xf32>, vector<2x128xf32>, vector<8x128xf32> -> vector<8x128xf32>
    %109 = arith.addf %105, %108 : vector<8x128xf32>
    %c0_74 = arith.constant 0 : index
    %c2_75 = arith.constant 2 : index
    %c0_76 = arith.constant 0 : index
    %c0_77 = arith.constant 0 : index
    %110 = vector.load %arg5[%c0_74, %c2_75, %c0_76, %c0_77] : memref<1x12x8x128xf32, #tpu.memory_space<vmem>>, vector<1x1x8x128xf32>
    %111 = vector.shape_cast %110 : vector<1x1x8x128xf32> to vector<8x128xf32>
    %112 = vector.shape_cast %109 : vector<8x128xf32> to vector<1x1x8x128xf32>
    tpu.vector_store %arg5[%c0_74, %c2_75, %c0_76, %c0_77], %112 {strides = array<i32>} : memref<1x12x8x128xf32, #tpu.memory_space<vmem>>, vector<1x1x8x128xf32>,
    %c0_78 = arith.constant 0 : index
    %c6 = arith.constant 6 : index
    %c0_79 = arith.constant 0 : index
    %c0_80 = arith.constant 0 : index
    %113 = vector.load %arg5[%c0_78, %c6, %c0_79, %c0_80] : memref<1x12x8x128xf32, #tpu.memory_space<vmem>>, vector<1x1x8x128xf32>
    %114 = vector.shape_cast %113 : vector<1x1x8x128xf32> to vector<8x128xf32>
    %115 = arith.mulf %101, %101 : vector<2x128xf32>
    %cst_81 = arith.constant dense<0.000000e+00> : vector<8x128xf32>
    %116 = tpu.matmul %34, %115, %cst_81 {dimension_numbers = #tpu.dot_dimension_numbers<[1], [0], [0], [1], [0, 0, 1, 1], [], []>, precision = #tpu.contract_precision<fp32>} : vector<8x2xf32>, vector<2x128xf32>, vector<8x128xf32> -> vector<8x128xf32>
    %117 = arith.addf %114, %116 : vector<8x128xf32>
    %c0_82 = arith.constant 0 : index
    %c6_83 = arith.constant 6 : index
    %c0_84 = arith.constant 0 : index
    %c0_85 = arith.constant 0 : index
    %118 = vector.load %arg5[%c0_82, %c6_83, %c0_84, %c0_85] : memref<1x12x8x128xf32, #tpu.memory_space<vmem>>, vector<1x1x8x128xf32>
    %119 = vector.shape_cast %118 : vector<1x1x8x128xf32> to vector<8x128xf32>
    %120 = vector.shape_cast %117 : vector<8x128xf32> to vector<1x1x8x128xf32>
    tpu.vector_store %arg5[%c0_82, %c6_83, %c0_84, %c0_85], %120 {strides = array<i32>} : memref<1x12x8x128xf32, #tpu.memory_space<vmem>>, vector<1x1x8x128xf32>,
    %c0_86 = arith.constant 0 : index
    %c10 = arith.constant 10 : index
    %c0_87 = arith.constant 0 : index
    %c0_88 = arith.constant 0 : index
    %121 = vector.load %arg5[%c0_86, %c10, %c0_87, %c0_88] : memref<1x12x8x128xf32, #tpu.memory_space<vmem>>, vector<1x1x8x128xf32>
    %122 = vector.shape_cast %121 : vector<1x1x8x128xf32> to vector<8x128xf32>
    %cst_89 = arith.constant 1.000000e+00 : f32
    %cst_90 = arith.constant 0.000000e+00 : f32
    %123 = vector.broadcast %cst_89 : f32 to vector<2x128xf32>
    %124 = vector.broadcast %cst_90 : f32 to vector<2x128xf32>
    %125 = arith.select %103, %123, %124 : vector<2x128xi1>, vector<2x128xf32>
    %cst_91 = arith.constant dense<0.000000e+00> : vector<8x128xf32>
    %126 = tpu.matmul %34, %125, %cst_91 {dimension_numbers = #tpu.dot_dimension_numbers<[1], [0], [0], [1], [0, 0, 1, 1], [], []>, precision = #tpu.contract_precision<fp32>} : vector<8x2xf32>, vector<2x128xf32>, vector<8x128xf32> -> vector<8x128xf32>
    %127 = arith.addf %122, %126 : vector<8x128xf32>
    %c0_92 = arith.constant 0 : index
    %c10_93 = arith.constant 10 : index
    %c0_94 = arith.constant 0 : index
    %c0_95 = arith.constant 0 : index
    %128 = vector.load %arg5[%c0_92, %c10_93, %c0_94, %c0_95] : memref<1x12x8x128xf32, #tpu.memory_space<vmem>>, vector<1x1x8x128xf32>
    %129 = vector.shape_cast %128 : vector<1x1x8x128xf32> to vector<8x128xf32>
    %130 = vector.shape_cast %127 : vector<8x128xf32> to vector<1x1x8x128xf32>
    tpu.vector_store %arg5[%c0_92, %c10_93, %c0_94, %c0_95], %130 {strides = array<i32>} : memref<1x12x8x128xf32, #tpu.memory_space<vmem>>, vector<1x1x8x128xf32>,
    %131 = vector.extract_strided_slice %11 {offsets = [3, 0, 0], sizes = [1, 2, 128], strides = [1, 1, 1]} : vector<4x2x128xf32> to vector<1x2x128xf32>
    %132 = vector.shape_cast %131 : vector<1x2x128xf32> to vector<2x128xf32>
    %133 = arith.mulf %132, %13 : vector<2x128xf32>
    %c3_i32 = arith.constant 3 : i32
    %134 = vector.broadcast %c3_i32 : i32 to vector<2x128xi32>
    %135 = arith.cmpi eq, %6, %134 : vector<2x128xi32>
    %c0_96 = arith.constant 0 : index
    %c3 = arith.constant 3 : index
    %c0_97 = arith.constant 0 : index
    %c0_98 = arith.constant 0 : index
    %136 = vector.load %arg5[%c0_96, %c3, %c0_97, %c0_98] : memref<1x12x8x128xf32, #tpu.memory_space<vmem>>, vector<1x1x8x128xf32>
    %137 = vector.shape_cast %136 : vector<1x1x8x128xf32> to vector<8x128xf32>
    %cst_99 = arith.constant 0.000000e+00 : f32
    %138 = vector.broadcast %cst_99 : f32 to vector<2x128xf32>
    %139 = arith.select %135, %133, %138 : vector<2x128xi1>, vector<2x128xf32>
    %cst_100 = arith.constant dense<0.000000e+00> : vector<8x128xf32>
    %140 = tpu.matmul %34, %139, %cst_100 {dimension_numbers = #tpu.dot_dimension_numbers<[1], [0], [0], [1], [0, 0, 1, 1], [], []>, precision = #tpu.contract_precision<fp32>} : vector<8x2xf32>, vector<2x128xf32>, vector<8x128xf32> -> vector<8x128xf32>
    %141 = arith.addf %137, %140 : vector<8x128xf32>
    %c0_101 = arith.constant 0 : index
    %c3_102 = arith.constant 3 : index
    %c0_103 = arith.constant 0 : index
    %c0_104 = arith.constant 0 : index
    %142 = vector.load %arg5[%c0_101, %c3_102, %c0_103, %c0_104] : memref<1x12x8x128xf32, #tpu.memory_space<vmem>>, vector<1x1x8x128xf32>
    %143 = vector.shape_cast %142 : vector<1x1x8x128xf32> to vector<8x128xf32>
    %144 = vector.shape_cast %141 : vector<8x128xf32> to vector<1x1x8x128xf32>
    tpu.vector_store %arg5[%c0_101, %c3_102, %c0_103, %c0_104], %144 {strides = array<i32>} : memref<1x12x8x128xf32, #tpu.memory_space<vmem>>, vector<1x1x8x128xf32>,
    %c0_105 = arith.constant 0 : index
    %c7 = arith.constant 7 : index
    %c0_106 = arith.constant 0 : index
    %c0_107 = arith.constant 0 : index
    %145 = vector.load %arg5[%c0_105, %c7, %c0_106, %c0_107] : memref<1x12x8x128xf32, #tpu.memory_space<vmem>>, vector<1x1x8x128xf32>
    %146 = vector.shape_cast %145 : vector<1x1x8x128xf32> to vector<8x128xf32>
    %147 = arith.mulf %133, %133 : vector<2x128xf32>
    %cst_108 = arith.constant dense<0.000000e+00> : vector<8x128xf32>
    %148 = tpu.matmul %34, %147, %cst_108 {dimension_numbers = #tpu.dot_dimension_numbers<[1], [0], [0], [1], [0, 0, 1, 1], [], []>, precision = #tpu.contract_precision<fp32>} : vector<8x2xf32>, vector<2x128xf32>, vector<8x128xf32> -> vector<8x128xf32>
    %149 = arith.addf %146, %148 : vector<8x128xf32>
    %c0_109 = arith.constant 0 : index
    %c7_110 = arith.constant 7 : index
    %c0_111 = arith.constant 0 : index
    %c0_112 = arith.constant 0 : index
    %150 = vector.load %arg5[%c0_109, %c7_110, %c0_111, %c0_112] : memref<1x12x8x128xf32, #tpu.memory_space<vmem>>, vector<1x1x8x128xf32>
    %151 = vector.shape_cast %150 : vector<1x1x8x128xf32> to vector<8x128xf32>
    %152 = vector.shape_cast %149 : vector<8x128xf32> to vector<1x1x8x128xf32>
    tpu.vector_store %arg5[%c0_109, %c7_110, %c0_111, %c0_112], %152 {strides = array<i32>} : memref<1x12x8x128xf32, #tpu.memory_space<vmem>>, vector<1x1x8x128xf32>,
    %c0_113 = arith.constant 0 : index
    %c11 = arith.constant 11 : index
    %c0_114 = arith.constant 0 : index
    %c0_115 = arith.constant 0 : index
    %153 = vector.load %arg5[%c0_113, %c11, %c0_114, %c0_115] : memref<1x12x8x128xf32, #tpu.memory_space<vmem>>, vector<1x1x8x128xf32>
    %154 = vector.shape_cast %153 : vector<1x1x8x128xf32> to vector<8x128xf32>
    %cst_116 = arith.constant 1.000000e+00 : f32
    %cst_117 = arith.constant 0.000000e+00 : f32
    %155 = vector.broadcast %cst_116 : f32 to vector<2x128xf32>
    %156 = vector.broadcast %cst_117 : f32 to vector<2x128xf32>
    %157 = arith.select %135, %155, %156 : vector<2x128xi1>, vector<2x128xf32>
    %cst_118 = arith.constant dense<0.000000e+00> : vector<8x128xf32>
    %158 = tpu.matmul %34, %157, %cst_118 {dimension_numbers = #tpu.dot_dimension_numbers<[1], [0], [0], [1], [0, 0, 1, 1], [], []>, precision = #tpu.contract_precision<fp32>} : vector<8x2xf32>, vector<2x128xf32>, vector<8x128xf32> -> vector<8x128xf32>
    %159 = arith.addf %154, %158 : vector<8x128xf32>
    %c0_119 = arith.constant 0 : index
    %c11_120 = arith.constant 11 : index
    %c0_121 = arith.constant 0 : index
    %c0_122 = arith.constant 0 : index
    %160 = vector.load %arg5[%c0_119, %c11_120, %c0_121, %c0_122] : memref<1x12x8x128xf32, #tpu.memory_space<vmem>>, vector<1x1x8x128xf32>
    %161 = vector.shape_cast %160 : vector<1x1x8x128xf32> to vector<8x128xf32>
    %162 = vector.shape_cast %159 : vector<8x128xf32> to vector<1x1x8x128xf32>
    tpu.vector_store %arg5[%c0_119, %c11_120, %c0_121, %c0_122], %162 {strides = array<i32>} : memref<1x12x8x128xf32, #tpu.memory_space<vmem>>, vector<1x1x8x128xf32>,
    return
  }
  func.func @transform_0(%arg0: i32, %arg1: i32, %arg2: i32) -> (i32, i32, i32, i32) {
    %c1_i32 = arith.constant 1 : i32
    %0 = arith.muli %arg0, %c1_i32 : i32
    %1 = arith.addi %0, %arg2 : i32
    %c0_i32 = arith.constant 0 : i32
    %2 = arith.minsi %1, %c0_i32 : i32
    %c0_i32_0 = arith.constant 0 : i32
    %c0_i32_1 = arith.constant 0 : i32
    %c0_i32_2 = arith.constant 0 : i32
    return %arg1, %c0_i32_0, %2, %c0_i32_1 : i32, i32, i32, i32
  }
  func.func @transform_1(%arg0: i32, %arg1: i32, %arg2: i32) -> (i32, i32, i32) {
    %c1_i32 = arith.constant 1 : i32
    %0 = arith.muli %arg0, %c1_i32 : i32
    %1 = arith.addi %0, %arg2 : i32
    %c0_i32 = arith.constant 0 : i32
    %2 = arith.minsi %1, %c0_i32 : i32
    %c0_i32_0 = arith.constant 0 : i32
    %c0_i32_1 = arith.constant 0 : i32
    return %arg1, %2, %c0_i32_0 : i32, i32, i32
  }
  func.func @transform_2(%arg0: i32, %arg1: i32, %arg2: i32) -> (i32, i32, i32, i32) {
    %c2_i32 = arith.constant 2 : i32
    %0 = arith.muli %arg0, %c2_i32 : i32
    %1 = arith.addi %0, %arg1 : i32
    %c0_i32 = arith.constant 0 : i32
    %c0_i32_0 = arith.constant 0 : i32
    %c0_i32_1 = arith.constant 0 : i32
    %c0_i32_2 = arith.constant 0 : i32
    return %1, %c0_i32, %c0_i32_0, %c0_i32_1 : i32, i32, i32, i32
  }
}

</mosaic_0001>

<bundles_post_ra>
// kernel: tpu_custom_call.1
= control target key start
LH: loop header
LB: loop body
LE: loop exit
PB: predicated region body
PF: predicated region fallthrough
CT: control target
= control target key end

     0   :  { %7 = vsyncpa [#allocation3], 0  ;;  %s7422_s0 = inlined_call_operand.hbm [shape: f32[2,4,2,128], index: 0, kind: input, shape index: {}]   ;;  %s7423_s1 = inlined_call_operand.hbm [shape: s32[2,2,128], index: 1, kind: input, shape index: {}]   ;;  %s7424_s2 = inlined_call_operand.hbm [shape: f32[2,12,8,128], index: 2, kind: output, shape index: {}]  }
   0x1   :  { %9 = vsyncpa [#allocation3 + $0x1], 0 }
   0x2   :  { %10 = vsyncpa [#allocation6], 0 }
   0x3   :  { %12 = vsyncpa [#allocation6 + $0x1], 0 }
   0x4   :  { %13 = vsyncpa [#allocation4], 0 }
   0x5   :  { %15 = vsyncpa [#allocation4 + $0x1], 0  ;;  %s6751_s9 = smov 0   ;;  %s6753_s10 = smov 0  }
   0x6   :  { %s6755_s11 = smov 0   ;;  %s6757_s12 = smov 0  }
   0x7   :  { %s6759_s13 = smov 0   ;;  %s6761_s14 = smov 0  }
   0x8 LB: > { %s5909_s15 = sadd.s32 4294967295, %s6725_s14   ;;  %s5910_s16 = sadd.s32 4294967294, %s6725_s14   ;;  %s6725_s14 = sphi %s6761_s14, %s21_s14   ;;  %s6721_s13 = sphi %s6759_s13, %s7435_s13   ;;  %s6717_s12 = sphi %s6757_s12, %s7434_s12   ;;  %s6713_s11 = sphi %s6755_s11, %s7433_s11   ;;  %s6709_s10 = sphi %s6753_s10, %s7432_s10   ;;  %s6705_s9 = sphi %s6751_s9, %s7431_s9  }
   0x9   : > { %s36_s17 = sadd.s32 1, %s6721_s13  ;;  %s55_s18 = sadd.s32 1, %s6713_s11 }
   0xa   : > { %p38_p0 = scmp.ge.s32.totalorder %s36_s17, 2  ;;  %p62_p1 = scmp.ne.s32.totalorder %s6713_s11, %s6709_s10 }
   0xb   : > { %p63_p2 = scmp.eq.s32.totalorder %s6725_s14, 0  ;;  %p68_p3 = scmp.ne.s32.totalorder %s6709_s10, %s6705_s9 }
   0xc   : > { %s7437_s17 = smov (%p38_p0, %s36_s17), 0  ;;  %p69_p5 = scmp.eq.s32.totalorder %s5909_s15, 0 }
   0xd   : > { %p6792_p4 = por %p63_p2, %p62_p1  ;;  %s50_s20 = ssub.s32 %s6721_s13, %s7437_s17 }
   0xe   : > { %p130_p6 = scmp.eq.s32.totalorder %s5909_s15, 1  ;;  %p53_p7 = scmp.eq.s32.totalorder %s50_s20, 0 }
   0xf   : > { %p6798_p8 = por %p69_p5, %p68_p3  ;;  %p136_p10 = scmp.eq.s32.totalorder %s5910_s16, 1 }
  0x10   : > { %p6802_p9 = por %p130_p6, %p62_p1  ;;  %p5912_p12 = scmp.ge.s32.totalorder %s6725_s14, 2 }
  0x11   : > { %s6807_s23 = scalar_select %p53_p7, %s6713_s11, %s55_s18  }
  0x12   : > { %p6809_p11 = por %p136_p10, %p68_p3  ;;  %p6519_p13 = scmp.lt.s32.totalorder %s6725_s14, 2 }
  0x13   : > { %s6816_s25 = sand.u32 1, %s6713_s11   ;;  %s5995_s27 = sshll.u32 %s6721_s13, 7 }
  0x14   : > { %s5913_s26 = sshll.u32 %s6816_s25, 3  ;;  %s170_s30 = scalar_lea.hbm %s7422_s0, %s5995_s27 }
  0x15   : > { %s160_s3 = scalar_lea.vmem [#allocation2], %s5913_s26  ;;  %p6825_p0 = pnand %p6519_p13, %p6792_p4 }
  0x16   : > { %s171_s4 = sshll.u32 %s160_s3, 4  ;;  %p5918_p1 = scmp.ge.s32.totalorder %s6725_s14, 1  ;;  %s172_s4 = int_to_ptr.vmem [resolvable:$true] %s171_s4 }
  0x17   : > { %s157_s6 = scalar_lea.sflag [#allocation3], %s6816_s25  ;;  %p6587_p2 = pneg %p6825_p0 }
  0x18   : > { %s6598_s7 = scalar_lea.vmem %s172_s4, 128  ;;  %s6727_s8 = smov [#allocation2]  }
  0x19   : > { %p6599_p3 = scmp.ne.s32.totalorder %s172_s4, %s6598_s7  ;;  %s6603_s15 = sshll.u32 %s6727_s8, 4  ;;  %s6604_s15 = int_to_ptr.vmem [resolvable:$false] %s6603_s15 }
  0x1a   : > { %s6605_s16 = scalar_lea.vmem %s6604_s15, 256  ;;  %p6606_p4 = scmp.lt.s32.totalorder %s172_s4, %s6604_s15 }
  0x1b   : > { %p6601_p5 = pnand %p6599_p3, %p6587_p2  ;;  %p6607_p7 = scmp.lt.s32.totalorder %s6605_s16, %s6598_s7 }
  0x1d   : > { %p6602_p6 = pneg %p6601_p5  ;;  %p6608_p10 = por %p6607_p7, %p6606_p4 }
  0x1f   : > { %p6609_p13 = pnand %p6608_p10, %p6602_p6 }
  0x21   : > { %6612 = shalt.err (!%p6609_p13)
}
  0x22   : > { %s6728_s18 = smov 32   ;;  %s6729_s19 = smov 2  }
  0x23   : > { %6511 = dma.hbm_to_vmem [thread:$0]  (!%p6825_p0), %s170_s30, 128, %s172_s4, %s157_s6, %s6728_s18, %s6728_s18, %s6729_s19  }
  0x24   : > { %p201_p3 = scmp.lt.s32.totalorder %s6725_s14, 3  ;;  %s5916_s20 = sshll.u32 %s6816_s25, 1 }
  0x25   : > { %s5917_s26 = sshll.u32 %s6721_s13, 5  ;;  %s185_s7 = scalar_lea.vmem [#allocation5], %s5916_s20 }
  0x26   : > { %p6843_p5 = pnand %p5918_p1, %p201_p3  ;;  %s194_s3 = scalar_lea.hbm %s7423_s1, %s5917_s26 }
  0x27   : > { %s196_s8 = sshll.u32 %s185_s7, 4  ;;  %s182_s15 = scalar_lea.sflag [#allocation6], %s6816_s25  ;;  %s197_s8 = int_to_ptr.vmem [resolvable:$true] %s196_s8 }
  0x28   : > { %s6626_s16 = scalar_lea.vmem %s197_s8, 32  ;;  %s6730_s30 = smov [#allocation5]  }
  0x29   : > { %p6627_p6 = scmp.ne.s32.totalorder %s197_s8, %s6626_s16  ;;  %s6631_s4 = sshll.u32 %s6730_s30, 4  ;;  %s6632_s4 = int_to_ptr.vmem [resolvable:$false] %s6631_s4 }
  0x2a   : > { %s6633_s6 = scalar_lea.vmem %s6632_s4, 64  ;;  %p6634_p1 = scmp.lt.s32.totalorder %s197_s8, %s6632_s4 }
  0x2b   : > { %p6629_p4 = pnand %p6627_p6, %p6587_p2  ;;  %p6635_p10 = scmp.lt.s32.totalorder %s6633_s6, %s6626_s16 }
  0x2d   : > { %p6630_p7 = pneg %p6629_p4  ;;  %p6636_p13 = por %p6635_p10, %p6634_p1 }
  0x2f   : > { %p6637_p3 = pnand %p6636_p13, %p6630_p7 }
  0x31   : > { %6640 = shalt.err (!%p6637_p3)
}
  0x32   : > { %6514 = dma.hbm_to_vmem [thread:$0]  (!%p6825_p0), %s194_s3, 32, %s197_s8, %s182_s15  }
  0x33   : > { %205 = sbr.rel (%p6843_p5) target bundleno = 471 (0x1d7), region = 28  ;;  %s6859_s25 = sand.u32 (!%p6843_p5), 1, %s6709_s10  }
  0x34   : > { %s5919_s18 = sshll.u32 (!%p6843_p5), %s6859_s25, 3  ;;  %s208_s19 = scalar_lea.sflag (!%p6843_p5), [#allocation3], %s6859_s25 }
  0x35   : > { %s211_s20 = scalar_lea.vmem (!%p6843_p5), [#allocation2], %s5919_s18 }
  0x38   : > { %6692 = dma.done.wait (%p6798_p8), %s208_s19, 128  }
  0x39   : > { %6694 = vsyncadd (%p6798_p8), %s208_s19, 4294967168  ;;  %s5920_s5 = sshll.u32 %s6859_s25, 1  ;;  %s217_s26 = scalar_lea.sflag [#allocation6], %s6859_s25 }
  0x3a   : > { %s6869_s27 = scalar_lea.vmem [#allocation5], %s5920_s5 }
  0x3b   : > { %6696 = dma.done.wait (%p6798_p8), %s217_s26, 32  }
  0x3c   : > { %6698 = vsyncadd (%p6798_p8), %s217_s26, 4294967264  ;;  %v6731_v0 = vmov 0.0   ;;  %vm6732_vm0 = vmmov 0   ;;  %vm275_vm1 = vcmask 1041408   ;;  %v270_v1 = vld [vmem:[%s211_s20] sm:$0x3]  ;;  %v303_v20 = vlaneseq }
  0x3d   : > { %6140 = vmatprep.subr.mxu0 %v6731_v0  ;;  %6142 = vmatprep.mubr.msk.f32.mxu0 %vm6732_vm0, %v6731_v0  ;;  %v271_v2 = vld [vmem:[%s211_s20 + $0x2] sm:$0x3]  ;;  %v272_v3 = vld [vmem:[%s211_s20 + $0x4] sm:$0x3]  ;;  %v273_v4 = vld [vmem:[%s211_s20 + $0x6] sm:$0x3] }
  0x3e   : > { %6145 = vmatprep.subr.mxu1 %v6731_v0  ;;  %6147 = vmatprep.mubr.msk.f32.mxu1 %vm6732_vm0, %v6731_v0  ;;  %v276_v5 = vsel %vm275_vm1, %v270_v1, -inf  ;;  %v277_v6 = vsel %vm275_vm1, %v271_v2, -inf  ;;  %v278_v7 = vsel %vm275_vm1, %v272_v3, -inf  ;;  %v279_v8 = vsel %vm275_vm1, %v273_v4, -inf  ;;  %v6903_v39 = vld [vmem:[%s6869_s27] sm:$0x3] }
  0x3f   : > { %v280_v9 = vmax.f32 %v276_v5, %v277_v6  ;;  %v281_v10 = vmax.f32 %v278_v7, %v279_v8  ;;  %v304_v21 = vand.u32 127, %v303_v20  ;;  %v318_v26 = vshrl.u32 %v303_v20, 7  ;;  %s6500_s21 = smul.u32 96, %s6859_s25  ;;  %s5782_s16 = scalar_lea.sflag [#allocation4], %s6859_s25 }
  0x40   : > { %vm326_vm3 = vcmask 15360   ;;  %vm323_vm4 = vcmp.eq.s32.totalorder %v6903_v39, 0  ;;  %vm3054_vm5 = vcmp.eq.s32.totalorder %v6903_v39, 2  ;;  %vm4418_vm6 = vcmp.eq.s32.totalorder %v6903_v39, 3  ;;  %s6501_s29 = smul.u32 1536, %s6717_s12  ;;  %s6733_s12 = smov [#allocation7]  }
  0x41   : > { %v282_v11 = vmax.f32 %v280_v9, %v281_v10  ;;  %v309_v25 = vand.u32 7, %v304_v21  ;;  %v6945_v60 = vsel %vm323_vm4, 1.0, %v6731_v0  ;;  %vm1690_vm7 = vcmp.eq.s32.totalorder %v6903_v39, 1  ;;  %s7353_s28 = scalar_lea.vmem [#allocation7], %s6500_s21  ;;  %s6645_s4 = sshll.u32 %s6733_s12, 4  ;;  %s6646_s4 = int_to_ptr.vmem [resolvable:$false] %s6645_s4 }
  0x42   : > { %v1239_v62 = vsel %vm275_vm1, %v6945_v60, 0  ;;  %s5797_s3 = sshll.u32 %s7353_s28, 4  ;;  %s7371_s15 = scalar_lea.hbm %s7424_s2, %s6501_s29  ;;  %s7373_s3 = int_to_ptr.vmem [resolvable:$true] %s5797_s3 }
  0x43   : > { %v283_v12 = vsub.f32 %v270_v1, %v282_v11  ;;  %v284_v13 = vsub.f32 %v271_v2, %v282_v11  ;;  %v285_v14 = vsub.f32 %v272_v3, %v282_v11  ;;  %v286_v15 = vsub.f32 %v273_v4, %v282_v11  ;;  %s6641_s30 = scalar_lea.vmem %s7373_s3, 1536  ;;  %s6647_s6 = scalar_lea.vmem %s6646_s4, 3072 }
  0x44   : > { %vm319_vm2 = vcmp.eq.s32.totalorder %v309_v25, %v318_v26  ;;  %v1349_v2 = vsub.f32 %v1239_v62, %v1239_v62  ;;  %p6642_p8 = scmp.ne.s32.totalorder %s7373_s3, %s6641_s30  ;;  %p6648_p5 = scmp.lt.s32.totalorder %s7373_s3, %s6646_s4 }
  0x45   : > { %v287_v16 = vmul.f32 1.442695, %v283_v12  ;;  %v289_v17 = vmul.f32 1.442695, %v284_v13  ;;  %v291_v18 = vmul.f32 1.442695, %v285_v14  ;;  %p6649_p6 = scmp.lt.s32.totalorder %s6647_s6, %s6641_s30 }
  0x46   : > { %v293_v19 = vmul.f32 1.442695, %v286_v15  ;;  %v6893_v35 = vsel %vm319_vm2, 1.0, %v6731_v0  ;;  %v1350_v4 = vand.u32 4294901760, %v1349_v2  ;;  %p6643_p0 = pnand %p6642_p8, %p6802_p9 }
  0x47   : > { %6575 = vpow2.f32 %v287_v16  ;;  %v328_v36 = vsel %vm326_vm3, %v6893_v35, 0  ;;  %p6650_p4 = por %p6649_p6, %p6648_p5 }
  0x48   : > { %6577 = vpow2.f32 %v289_v17  ;;  %v6897_v37 = vsub.f32 %v328_v36, %v328_v36  ;;  %v1351_v6 = vsub.f32 %v1349_v2, %v1350_v4  ;;  %p6644_p2 = pneg %p6643_p0 }
  0x49   : > { %6579 = vpow2.f32 %v291_v18  ;;  %v7055_v18 = vsel %vm1690_vm7, 1.0, %v6731_v0 }
  0x4a   : > { %6581 = vpow2.f32 %v293_v19  ;;  %v6900_v38 = vand.u32 4294901760, %v6897_v37  ;;  %v1352_v8 = vand.u32 4294901760, %v1351_v6  ;;  %v2603_v20 = vsel %vm275_vm1, %v7055_v18, 0  ;;  %p6651_p7 = pnand %p6650_p4, %p6644_p2 }
  0x4c   : > { %v402_v41 = vsub.f32 %v6897_v37, %v6900_v38 }
  0x4e   : > { %v6916_v48 = vand.u32 4294901760, %v402_v41  ;;  %v7166_v41 = vsel %vm3054_vm5, 1.0, %v6731_v0 }
  0x54   : > { %v6576_v22 = vpop.eup %6575 }
  0x55   : > { %v6885_v23 = vpop.eup %6577  ;;  %v295_v24 = vsel %vm275_vm1, %v6576_v22, 0.0 }
  0x56   : > { %v6580_v27 = vpop.eup %6579  ;;  %v296_v28 = vsel %vm275_vm1, %v6885_v23, 0.0 }
  0x57   : > { %v6582_v29 = vpop.eup %6581  ;;  %v297_v30 = vadd.f32 %v296_v28, %v295_v24  ;;  %v298_v31 = vsel %vm275_vm1, %v6580_v27, 0.0 }
  0x58   : > { %v300_v32 = vsel %vm275_vm1, %v6582_v29, 0.0 }
  0x59   : > { %v299_v33 = vadd.f32 %v298_v31, %v297_v30 }
  0x5b   : > { %v301_v34 = vadd.f32 %v300_v32, %v299_v33 }
  0x5d   : > { %6583 = vrcp.f32 %v301_v34 }
  0x6a   : > { %v6584_v40 = vpop.eup %6583 }
  0x6b   : > { %v322_v42 = vmul.f32 %v6584_v40, %v6576_v22  ;;  %v6908_v43 = vmul.f32 %v6584_v40, %v6580_v27  ;;  %v6911_v44 = vmul.f32 %v6584_v40, %v6582_v29  ;;  %v1689_v63 = vmul.f32 %v6584_v40, %v6885_v23 }
  0x6c   : > { %v2713_v22 = vsub.f32 %v2603_v20, %v2603_v20 }
  0x6d   : > { %v325_v45 = vsel %vm323_vm4, %v322_v42, 0.0  ;;  %v783_v46 = vmul.f32 %v322_v42, %v322_v42  ;;  %v6921_v49 = vsel %vm3054_vm5, %v6908_v43, 0.0  ;;  %v6932_v54 = vsel %vm4418_vm6, %v6911_v44, 0.0 }
  0x6e   : > { %v331_v47 = vsel %vm275_vm1, %v325_v45, 0  ;;  %v1693_v3 = vsel %vm1690_vm7, %v1689_v63, 0.0  ;;  %v2147_v10 = vmul.f32 %v1689_v63, %v1689_v63  ;;  %v2714_v23 = vand.u32 4294901760, %v2713_v22 }
  0x6f   : > { %v364_v50 = vand.u32 4294901760, %v331_v47  ;;  %v785_v51 = vsel %vm275_vm1, %v783_v46, 0  ;;  %v1695_v5 = vsel %vm275_vm1, %v1693_v3, 0  ;;  %v3059_v24 = vsel %vm275_vm1, %v6921_v49, 0 }
  0x70   : > { %v6925_v52 = vand.u32 4294901760, %v785_v51  ;;  %v6988_v7 = vand.u32 4294901760, %v1695_v5  ;;  %v2149_v12 = vsel %vm275_vm1, %v2147_v10, 0  ;;  %v2715_v25 = vsub.f32 %v2713_v22, %v2714_v23 }
  0x71   : > { %6141 = vmatpush3.msra.mxu0 %v364_v50  ;;  %v441_v53 = vsub.f32 %v331_v47, %v364_v50  ;;  %v7024_v14 = vand.u32 4294901760, %v2149_v12  ;;  %v7097_v26 = vand.u32 4294901760, %v3059_v24  ;;  %v3511_v29 = vmul.f32 %v6908_v43, %v6908_v43 }
  0x72   : > { %6143 = vmatmul.mubr.f32.vlgmr.msra.gmra.mxu0 %v6916_v48  ;;  %6150 = vmatprep.subr.mxu0 %v6731_v0  ;;  %v895_v56 = vsub.f32 %v785_v51, %v6925_v52  ;;  %v1805_v9 = vsub.f32 %v1695_v5, %v6988_v7  ;;  %v2716_v27 = vand.u32 4294901760, %v2715_v25  ;;  %v3967_v43 = vsel %vm275_vm1, %v7166_v41, 0 }
  0x73   : > { %v442_v55 = vand.u32 4294901760, %v441_v53  ;;  %6151 = vmatpush3.msra.mxu0 %v441_v53  ;;  %6152 = vmatprep.mubr.msk.f32.mxu0 %vm6732_vm0, %v6731_v0  ;;  %v2259_v16 = vsub.f32 %v2149_v12, %v7024_v14  ;;  %v3169_v28 = vsub.f32 %v3059_v24, %v7097_v26  ;;  %v3513_v31 = vsel %vm275_vm1, %v3511_v29, 0 }
  0x74   : > { %6160 = vmatprep.subr.mxu0 %v6731_v0  ;;  %v896_v59 = vand.u32 4294901760, %v895_v56  ;;  %v1806_v11 = vand.u32 4294901760, %v1805_v9  ;;  %v7135_v33 = vand.u32 4294901760, %v3513_v31  ;;  %v4077_v46 = vsub.f32 %v3967_v43, %v3967_v43 }
  0x75   : > { %v443_v57 = vsub.f32 %v441_v53, %v442_v55  ;;  %v2260_v17 = vand.u32 4294901760, %v2259_v16  ;;  %v3170_v30 = vand.u32 4294901760, %v3169_v28  ;;  %v4423_v49 = vsel %vm275_vm1, %v6932_v54, 0 }
  0x76   : > { %6153 = vmatmul.mubr.f32.vlgmr.msra.gmra.mxu0 %v6897_v37  ;;  %v897_v61 = vsub.f32 %v895_v56, %v896_v59  ;;  %v1807_v13 = vsub.f32 %v1805_v9, %v1806_v11  ;;  %v3623_v36 = vsub.f32 %v3513_v31, %v7135_v33  ;;  %v4078_v47 = vand.u32 4294901760, %v4077_v46 }
  0x77   : > { %v444_v58 = vand.u32 4294901760, %v443_v57  ;;  %6161 = vmatpush3.msra.mxu0 %v442_v55  ;;  %6162 = vmatprep.mubr.msk.f32.mxu0 %vm6732_vm0, %v6731_v0  ;;  %v2261_v19 = vsub.f32 %v2259_v16, %v2260_v17  ;;  %v3171_v32 = vsub.f32 %v3169_v28, %v3170_v30  ;;  %v7208_v51 = vand.u32 4294901760, %v4423_v49 }
  0x78   : > { %6170 = vmatprep.subr.mxu0 %v6731_v0  ;;  %v898_v1 = vand.u32 4294901760, %v897_v61  ;;  %v1808_v15 = vand.u32 4294901760, %v1807_v13  ;;  %v3624_v40 = vand.u32 4294901760, %v3623_v36  ;;  %v4875_v54 = vmul.f32 %v6911_v44, %v6911_v44 }
  0x79   : > { %6146 = vmatpush3.msra.mxu1 %v444_v58  ;;  %v2262_v21 = vand.u32 4294901760, %v2261_v19  ;;  %v3172_v34 = vand.u32 4294901760, %v3171_v32  ;;  %v4533_v53 = vsub.f32 %v4423_v49, %v7208_v51  ;;  %v5329_v61 = vsel %vm4418_vm6, 1.0, %v6731_v0 }
  0x7a   : > { %6148 = vmatmul.mubr.msk.f32.vlgmr.msra.gmra.mxu1 %vm326_vm3, %v6893_v35  ;;  %6155 = vmatprep.subr.mxu1 %v6731_v0  ;;  %v3625_v42 = vsub.f32 %v3623_v36, %v3624_v40  ;;  %v4877_v44 = vsel %vm275_vm1, %v4875_v54, 0  ;;  %v5331_v63 = vsel %vm275_vm1, %v5329_v61, 0 }
  0x7b   : > { %6156 = vmatpush3.msra.mxu1 %v364_v50  ;;  %6157 = vmatprep.mubr.msk.f32.mxu1 %vm6732_vm0, %v6731_v0  ;;  %v4534_v55 = vand.u32 4294901760, %v4533_v53  ;;  %v7246_v57 = vand.u32 4294901760, %v4877_v44 }
  0x7c   : > { %6165 = vmatprep.subr.mxu1 %v6731_v0  ;;  %6163 = vmatmul.mubr.msk.f32.vlgmr.msra.gmra.mxu0 %vm326_vm3, %v6893_v35  ;;  %v3626_v45 = vand.u32 4294901760, %v3625_v42 }
  0x7d   : > { %6171 = vmatpush3.msra.mxu0 %v6925_v52  ;;  %6172 = vmatprep.mubr.msk.f32.mxu0 %vm6732_vm0, %v6731_v0 }
  0x7e   : > { %6158 = vmatmul.mubr.f32.vlgmr.msra.gmra.mxu1 %v6900_v38  ;;  %6180 = vmatprep.subr.mxu0 %v6731_v0 }
  0x7f   : > { %6166 = vmatpush3.msra.mxu1 %v364_v50  ;;  %6167 = vmatprep.mubr.msk.f32.mxu1 %vm6732_vm0, %v6731_v0  ;;  %v4079_v50 = vsub.f32 %v4077_v46, %v4078_v47 }
  0x80   : > { %6175 = vmatprep.subr.mxu1 %v6731_v0  ;;  %6173 = vmatmul.mubr.f32.vlgmr.msra.gmra.mxu0 %v6916_v48 }
  0x81   : > { %6181 = vmatpush3.msra.mxu0 %v895_v56  ;;  %6182 = vmatprep.mubr.msk.f32.mxu0 %vm6732_vm0, %v6731_v0  ;;  %v4535_v56 = vsub.f32 %v4533_v53, %v4534_v55 }
  0x82   : > { %6168 = vmatmul.mubr.msk.f32.vlgmr.msra.gmra.mxu1 %vm326_vm3, %v6893_v35  ;;  %6190 = vmatprep.subr.mxu0 %v6731_v0 }
  0x83   : > { %6176 = vmatpush3.msra.mxu1 %v898_v1  ;;  %6177 = vmatprep.mubr.msk.f32.mxu1 %vm6732_vm0, %v6731_v0  ;;  %v4536_v58 = vand.u32 4294901760, %v4535_v56  ;;  %v5441_v1 = vsub.f32 %v5331_v63, %v5331_v63 }
  0x84   : > { %6185 = vmatprep.subr.mxu1 %v6731_v0  ;;  %6183 = vmatmul.mubr.f32.vlgmr.msra.gmra.mxu0 %v6897_v37 }
  0x85   : > { %6191 = vmatpush3.msra.mxu0 %v896_v59  ;;  %6192 = vmatprep.mubr.msk.f32.mxu0 %vm6732_vm0, %v6731_v0  ;;  %v4987_v59 = vsub.f32 %v4877_v44, %v7246_v57 }
  0x86   : > { %6178 = vmatmul.mubr.msk.f32.vlgmr.msra.gmra.mxu1 %vm326_vm3, %v6893_v35  ;;  %6200 = vmatprep.subr.mxu0 %v6731_v0 }
  0x87   : > { %6186 = vmatpush3.msra.mxu1 %v6925_v52  ;;  %6187 = vmatprep.mubr.msk.f32.mxu1 %vm6732_vm0, %v6731_v0 }
  0x88   : > { %6195 = vmatprep.subr.mxu1 %v6731_v0  ;;  %6193 = vmatmul.mubr.msk.f32.vlgmr.msra.gmra.mxu0 %vm326_vm3, %v6893_v35 }
  0x89   : > { %6201 = vmatpush3.msk.msra.mxu0 %vm275_vm1, %v6945_v60  ;;  %6202 = vmatprep.mubr.msk.f32.mxu0 %vm6732_vm0, %v6731_v0 }
  0x8a   : > { %6188 = vmatmul.mubr.f32.vlgmr.msra.gmra.mxu1 %v6900_v38  ;;  %6210 = vmatprep.subr.mxu0 %v6731_v0 }
  0x8b   : > { %6196 = vmatpush3.msra.mxu1 %v6925_v52  ;;  %6197 = vmatprep.mubr.msk.f32.mxu1 %vm6732_vm0, %v6731_v0  ;;  %v4080_v52 = vand.u32 4294901760, %v4079_v50 }
  0x8c   : > { %6205 = vmatprep.subr.mxu1 %v6731_v0  ;;  %6203 = vmatmul.mubr.f32.vlgmr.msra.gmra.mxu0 %v6916_v48 }
  0x8d   : > { %6211 = vmatpush3.msra.mxu0 %v1349_v2  ;;  %6212 = vmatprep.mubr.msk.f32.mxu0 %vm6732_vm0, %v6731_v0  ;;  %v5442_v2 = vand.u32 4294901760, %v5441_v1 }
  0x8e   : > { %6198 = vmatmul.mubr.msk.f32.vlgmr.msra.gmra.mxu1 %vm326_vm3, %v6893_v35  ;;  %6220 = vmatprep.subr.mxu0 %v6731_v0 }
  0x8f   : > { %6206 = vmatpush3.msra.mxu1 %v1352_v8  ;;  %6207 = vmatprep.mubr.msk.f32.mxu1 %vm6732_vm0, %v6731_v0  ;;  %v5443_v3 = vsub.f32 %v5441_v1, %v5442_v2 }
  0x90   : > { %6215 = vmatprep.subr.mxu1 %v6731_v0  ;;  %6213 = vmatmul.mubr.f32.vlgmr.msra.gmra.mxu0 %v6897_v37 }
  0x91   : > { %6221 = vmatpush3.msra.mxu0 %v1350_v4  ;;  %6222 = vmatprep.mubr.msk.f32.mxu0 %vm6732_vm0, %v6731_v0  ;;  %v5444_v4 = vand.u32 4294901760, %v5443_v3 }
  0x92   : > { %6208 = vmatmul.mubr.msk.f32.vlgmr.msra.gmra.mxu1 %vm326_vm3, %v6893_v35  ;;  %6230 = vmatprep.subr.mxu0 %v6731_v0 }
  0x93   : > { %6216 = vmatpush3.msk.msra.mxu1 %vm275_vm1, %v6945_v60  ;;  %6217 = vmatprep.mubr.msk.f32.mxu1 %vm6732_vm0, %v6731_v0 }
  0x94   : > { %6225 = vmatprep.subr.mxu1 %v6731_v0  ;;  %6223 = vmatmul.mubr.msk.f32.vlgmr.msra.gmra.mxu0 %vm326_vm3, %v6893_v35 }
  0x95   : > { %6231 = vmatpush3.msra.mxu0 %v6988_v7  ;;  %6232 = vmatprep.mubr.msk.f32.mxu0 %vm6732_vm0, %v6731_v0 }
  0x96   : > { %6218 = vmatmul.mubr.f32.vlgmr.msra.gmra.mxu1 %v6900_v38  ;;  %6240 = vmatprep.subr.mxu0 %v6731_v0 }
  0x97   : > { %6226 = vmatpush3.msk.msra.mxu1 %vm275_vm1, %v6945_v60  ;;  %6227 = vmatprep.mubr.msk.f32.mxu1 %vm6732_vm0, %v6731_v0  ;;  %v4988_v60 = vand.u32 4294901760, %v4987_v59 }
  0x98   : > { %6235 = vmatprep.subr.mxu1 %v6731_v0  ;;  %6233 = vmatmul.mubr.f32.vlgmr.msra.gmra.mxu0 %v6916_v48 }
  0x99   : > { %6241 = vmatpush3.msra.mxu0 %v1805_v9  ;;  %6242 = vmatprep.mubr.msk.f32.mxu0 %vm6732_vm0, %v6731_v0  ;;  %v4989_v62 = vsub.f32 %v4987_v59, %v4988_v60 }
  0x9a   : > { %6228 = vmatmul.mubr.msk.f32.vlgmr.msra.gmra.mxu1 %vm326_vm3, %v6893_v35  ;;  %6250 = vmatprep.subr.mxu0 %v6731_v0 }
  0x9b   : > { %6236 = vmatpush3.msra.mxu1 %v1808_v15  ;;  %6237 = vmatprep.mubr.msk.f32.mxu1 %vm6732_vm0, %v6731_v0  ;;  %v4990_v39 = vand.u32 4294901760, %v4989_v62 }
  0x9c   : > { %6245 = vmatprep.subr.mxu1 %v6731_v0  ;;  %6243 = vmatmul.mubr.f32.vlgmr.msra.gmra.mxu0 %v6897_v37 }
  0x9d   : > { %6251 = vmatpush3.msra.mxu0 %v1806_v11  ;;  %6252 = vmatprep.mubr.msk.f32.mxu0 %vm6732_vm0, %v6731_v0 }
  0x9e   : > { %6238 = vmatmul.mubr.msk.f32.vlgmr.msra.gmra.mxu1 %vm326_vm3, %v6893_v35  ;;  %6260 = vmatprep.subr.mxu0 %v6731_v0 }
  0x9f   : > { %6246 = vmatpush3.msra.mxu1 %v6988_v7  ;;  %6247 = vmatprep.mubr.msk.f32.mxu1 %vm6732_vm0, %v6731_v0 }
  0xa0   : > { %6255 = vmatprep.subr.mxu1 %v6731_v0  ;;  %6253 = vmatmul.mubr.msk.f32.vlgmr.msra.gmra.mxu0 %vm326_vm3, %v6893_v35 }
  0xa1   : > { %6261 = vmatpush3.msra.mxu0 %v7024_v14  ;;  %6262 = vmatprep.mubr.msk.f32.mxu0 %vm6732_vm0, %v6731_v0 }
  0xa2   : > { %6248 = vmatmul.mubr.f32.vlgmr.msra.gmra.mxu1 %v6900_v38  ;;  %6270 = vmatprep.subr.mxu0 %v6731_v0 }
  0xa3   : > { %6256 = vmatpush3.msra.mxu1 %v6988_v7  ;;  %6257 = vmatprep.mubr.msk.f32.mxu1 %vm6732_vm0, %v6731_v0 }
  0xa4   : > { %6265 = vmatprep.subr.mxu1 %v6731_v0  ;;  %6263 = vmatmul.mubr.f32.vlgmr.msra.gmra.mxu0 %v6916_v48 }
  0xa5   : > { %6271 = vmatpush3.msra.mxu0 %v2259_v16  ;;  %6272 = vmatprep.mubr.msk.f32.mxu0 %vm6732_vm0, %v6731_v0 }
  0xa6   : > { %6258 = vmatmul.mubr.msk.f32.vlgmr.msra.gmra.mxu1 %vm326_vm3, %v6893_v35  ;;  %6280 = vmatprep.subr.mxu0 %v6731_v0 }
  0xa7   : > { %6266 = vmatpush3.msra.mxu1 %v2262_v21  ;;  %6267 = vmatprep.mubr.msk.f32.mxu1 %vm6732_vm0, %v6731_v0 }
  0xa8   : > { %6275 = vmatprep.subr.mxu1 %v6731_v0  ;;  %6273 = vmatmul.mubr.f32.vlgmr.msra.gmra.mxu0 %v6897_v37 }
  0xa9   : > { %6281 = vmatpush3.msra.mxu0 %v2260_v17  ;;  %6282 = vmatprep.mubr.msk.f32.mxu0 %vm6732_vm0, %v6731_v0 }
  0xaa   : > { %6268 = vmatmul.mubr.msk.f32.vlgmr.msra.gmra.mxu1 %vm326_vm3, %v6893_v35  ;;  %6290 = vmatprep.subr.mxu0 %v6731_v0 }
  0xab   : > { %6276 = vmatpush3.msra.mxu1 %v7024_v14  ;;  %6277 = vmatprep.mubr.msk.f32.mxu1 %vm6732_vm0, %v6731_v0 }
  0xac   : > { %6285 = vmatprep.subr.mxu1 %v6731_v0  ;;  %6283 = vmatmul.mubr.msk.f32.vlgmr.msra.gmra.mxu0 %vm326_vm3, %v6893_v35 }
  0xad   : > { %6291 = vmatpush3.msk.msra.mxu0 %vm275_vm1, %v7055_v18  ;;  %6292 = vmatprep.mubr.msk.f32.mxu0 %vm6732_vm0, %v6731_v0 }
  0xae   : > { %6278 = vmatmul.mubr.f32.vlgmr.msra.gmra.mxu1 %v6900_v38  ;;  %6300 = vmatprep.subr.mxu0 %v6731_v0 }
  0xaf   : > { %6286 = vmatpush3.msra.mxu1 %v7024_v14  ;;  %6287 = vmatprep.mubr.msk.f32.mxu1 %vm6732_vm0, %v6731_v0 }
  0xb0   : > { %6295 = vmatprep.subr.mxu1 %v6731_v0  ;;  %6293 = vmatmul.mubr.f32.vlgmr.msra.gmra.mxu0 %v6916_v48 }
  0xb1   : > { %6301 = vmatpush3.msra.mxu0 %v2713_v22  ;;  %6302 = vmatprep.mubr.msk.f32.mxu0 %vm6732_vm0, %v6731_v0 }
  0xb2   : > { %6288 = vmatmul.mubr.msk.f32.vlgmr.msra.gmra.mxu1 %vm326_vm3, %v6893_v35  ;;  %6310 = vmatprep.subr.mxu0 %v6731_v0 }
  0xb3   : > { %6296 = vmatpush3.msra.mxu1 %v2716_v27  ;;  %6297 = vmatprep.mubr.msk.f32.mxu1 %vm6732_vm0, %v6731_v0 }
  0xb4   : > { %6305 = vmatprep.subr.mxu1 %v6731_v0  ;;  %6303 = vmatmul.mubr.f32.vlgmr.msra.gmra.mxu0 %v6897_v37 }
  0xb5   : > { %6311 = vmatpush3.msra.mxu0 %v2714_v23  ;;  %6312 = vmatprep.mubr.msk.f32.mxu0 %vm6732_vm0, %v6731_v0 }
  0xb6   : > { %6298 = vmatmul.mubr.msk.f32.vlgmr.msra.gmra.mxu1 %vm326_vm3, %v6893_v35  ;;  %6320 = vmatprep.subr.mxu0 %v6731_v0 }
  0xb7   : > { %6306 = vmatpush3.msk.msra.mxu1 %vm275_vm1, %v7055_v18  ;;  %6307 = vmatprep.mubr.msk.f32.mxu1 %vm6732_vm0, %v6731_v0 }
  0xb8   : > { %6315 = vmatprep.subr.mxu1 %v6731_v0  ;;  %6313 = vmatmul.mubr.msk.f32.vlgmr.msra.gmra.mxu0 %vm326_vm3, %v6893_v35 }
  0xb9   : > { %6321 = vmatpush3.msra.mxu0 %v7097_v26  ;;  %6322 = vmatprep.mubr.msk.f32.mxu0 %vm6732_vm0, %v6731_v0 }
  0xba   : > { %6308 = vmatmul.mubr.f32.vlgmr.msra.gmra.mxu1 %v6900_v38  ;;  %6330 = vmatprep.subr.mxu0 %v6731_v0 }
  0xbb   : > { %6316 = vmatpush3.msk.msra.mxu1 %vm275_vm1, %v7055_v18  ;;  %6317 = vmatprep.mubr.msk.f32.mxu1 %vm6732_vm0, %v6731_v0 }
  0xbc   : > { %6325 = vmatprep.subr.mxu1 %v6731_v0  ;;  %6323 = vmatmul.mubr.f32.vlgmr.msra.gmra.mxu0 %v6916_v48 }
  0xbd   : > { %6331 = vmatpush3.msra.mxu0 %v3169_v28  ;;  %6332 = vmatprep.mubr.msk.f32.mxu0 %vm6732_vm0, %v6731_v0 }
  0xbe   : > { %6318 = vmatmul.mubr.msk.f32.vlgmr.msra.gmra.mxu1 %vm326_vm3, %v6893_v35  ;;  %6340 = vmatprep.subr.mxu0 %v6731_v0 }
  0xbf   : > { %6326 = vmatpush3.msra.mxu1 %v3172_v34  ;;  %6327 = vmatprep.mubr.msk.f32.mxu1 %vm6732_vm0, %v6731_v0 }
  0xc0   : > { %6335 = vmatprep.subr.mxu1 %v6731_v0  ;;  %6333 = vmatmul.mubr.f32.vlgmr.msra.gmra.mxu0 %v6897_v37 }
  0xc1   : > { %6341 = vmatpush3.msra.mxu0 %v3170_v30  ;;  %6342 = vmatprep.mubr.msk.f32.mxu0 %vm6732_vm0, %v6731_v0 }
  0xc2   : > { %6328 = vmatmul.mubr.msk.f32.vlgmr.msra.gmra.mxu1 %vm326_vm3, %v6893_v35  ;;  %6350 = vmatprep.subr.mxu0 %v6731_v0 }
  0xc3   : > { %6336 = vmatpush3.msra.mxu1 %v7097_v26  ;;  %6337 = vmatprep.mubr.msk.f32.mxu1 %vm6732_vm0, %v6731_v0 }
  0xc4   : > { %6345 = vmatprep.subr.mxu1 %v6731_v0  ;;  %6343 = vmatmul.mubr.msk.f32.vlgmr.msra.gmra.mxu0 %vm326_vm3, %v6893_v35 }
  0xc5   : > { %6351 = vmatpush3.msra.mxu0 %v7135_v33  ;;  %6352 = vmatprep.mubr.msk.f32.mxu0 %vm6732_vm0, %v6731_v0 }
  0xc6   : > { %6338 = vmatmul.mubr.f32.vlgmr.msra.gmra.mxu1 %v6900_v38  ;;  %6360 = vmatprep.subr.mxu0 %v6731_v0 }
  0xc7   : > { %6346 = vmatpush3.msra.mxu1 %v7097_v26  ;;  %6347 = vmatprep.mubr.msk.f32.mxu1 %vm6732_vm0, %v6731_v0 }
  0xc8   : > { %6355 = vmatprep.subr.mxu1 %v6731_v0  ;;  %6353 = vmatmul.mubr.f32.vlgmr.msra.gmra.mxu0 %v6916_v48 }
  0xc9   : > { %6361 = vmatpush3.msra.mxu0 %v3623_v36  ;;  %6362 = vmatprep.mubr.msk.f32.mxu0 %vm6732_vm0, %v6731_v0 }
  0xca   : > { %6348 = vmatmul.mubr.msk.f32.vlgmr.msra.gmra.mxu1 %vm326_vm3, %v6893_v35  ;;  %6370 = vmatprep.subr.mxu0 %v6731_v0 }
  0xcb   : > { %6356 = vmatpush3.msra.mxu1 %v3626_v45  ;;  %6357 = vmatprep.mubr.msk.f32.mxu1 %vm6732_vm0, %v6731_v0 }
  0xcc   : > { %6365 = vmatprep.subr.mxu1 %v6731_v0  ;;  %6363 = vmatmul.mubr.f32.vlgmr.msra.gmra.mxu0 %v6897_v37 }
  0xcd   : > { %6371 = vmatpush3.msra.mxu0 %v3624_v40  ;;  %6372 = vmatprep.mubr.msk.f32.mxu0 %vm6732_vm0, %v6731_v0 }
  0xce   : > { %6358 = vmatmul.mubr.msk.f32.vlgmr.msra.gmra.mxu1 %vm326_vm3, %v6893_v35  ;;  %6380 = vmatprep.subr.mxu0 %v6731_v0 }
  0xcf   : > { %6366 = vmatpush3.msra.mxu1 %v7135_v33  ;;  %6367 = vmatprep.mubr.msk.f32.mxu1 %vm6732_vm0, %v6731_v0 }
  0xd0   : > { %6375 = vmatprep.subr.mxu1 %v6731_v0  ;;  %6373 = vmatmul.mubr.msk.f32.vlgmr.msra.gmra.mxu0 %vm326_vm3, %v6893_v35 }
  0xd1   : > { %6381 = vmatpush3.msk.msra.mxu0 %vm275_vm1, %v7166_v41  ;;  %6382 = vmatprep.mubr.msk.f32.mxu0 %vm6732_vm0, %v6731_v0 }
  0xd2   : > { %6368 = vmatmul.mubr.f32.vlgmr.msra.gmra.mxu1 %v6900_v38  ;;  %6390 = vmatprep.subr.mxu0 %v6731_v0 }
  0xd3   : > { %6376 = vmatpush3.msra.mxu1 %v7135_v33  ;;  %6377 = vmatprep.mubr.msk.f32.mxu1 %vm6732_vm0, %v6731_v0 }
  0xd4   : > { %6385 = vmatprep.subr.mxu1 %v6731_v0  ;;  %6383 = vmatmul.mubr.f32.vlgmr.msra.gmra.mxu0 %v6916_v48 }
  0xd5   : > { %6391 = vmatpush3.msra.mxu0 %v4077_v46  ;;  %6392 = vmatprep.mubr.msk.f32.mxu0 %vm6732_vm0, %v6731_v0 }
  0xd6   : > { %6378 = vmatmul.mubr.msk.f32.vlgmr.msra.gmra.mxu1 %vm326_vm3, %v6893_v35  ;;  %6400 = vmatprep.subr.mxu0 %v6731_v0 }
  0xd7   : > { %6386 = vmatpush3.msra.mxu1 %v4080_v52  ;;  %6387 = vmatprep.mubr.msk.f32.mxu1 %vm6732_vm0, %v6731_v0 }
  0xd8   : > { %6395 = vmatprep.subr.mxu1 %v6731_v0  ;;  %6393 = vmatmul.mubr.f32.vlgmr.msra.gmra.mxu0 %v6897_v37 }
  0xd9   : > { %6401 = vmatpush3.msra.mxu0 %v4078_v47  ;;  %6402 = vmatprep.mubr.msk.f32.mxu0 %vm6732_vm0, %v6731_v0 }
  0xda   : > { %6388 = vmatmul.mubr.msk.f32.vlgmr.msra.gmra.mxu1 %vm326_vm3, %v6893_v35  ;;  %6410 = vmatprep.subr.mxu0 %v6731_v0 }
  0xdb   : > { %6396 = vmatpush3.msk.msra.mxu1 %vm275_vm1, %v7166_v41  ;;  %6397 = vmatprep.mubr.msk.f32.mxu1 %vm6732_vm0, %v6731_v0 }
  0xdc   : > { %6405 = vmatprep.subr.mxu1 %v6731_v0  ;;  %6403 = vmatmul.mubr.msk.f32.vlgmr.msra.gmra.mxu0 %vm326_vm3, %v6893_v35 }
  0xdd   : > { %6411 = vmatpush3.msra.mxu0 %v7208_v51  ;;  %6412 = vmatprep.mubr.msk.f32.mxu0 %vm6732_vm0, %v6731_v0 }
  0xde   : > { %6398 = vmatmul.mubr.f32.vlgmr.msra.gmra.mxu1 %v6900_v38  ;;  %6420 = vmatprep.subr.mxu0 %v6731_v0 }
  0xdf   : > { %6406 = vmatpush3.msk.msra.mxu1 %vm275_vm1, %v7166_v41  ;;  %6407 = vmatprep.mubr.msk.f32.mxu1 %vm6732_vm0, %v6731_v0 }
  0xe0   : > { %6415 = vmatprep.subr.mxu1 %v6731_v0  ;;  %6413 = vmatmul.mubr.f32.vlgmr.msra.gmra.mxu0 %v6916_v48 }
  0xe1   : > { %6421 = vmatpush3.msra.mxu0 %v4533_v53  ;;  %6422 = vmatprep.mubr.msk.f32.mxu0 %vm6732_vm0, %v6731_v0 }
  0xe2   : > { %6408 = vmatmul.mubr.msk.f32.vlgmr.msra.gmra.mxu1 %vm326_vm3, %v6893_v35  ;;  %6430 = vmatprep.subr.mxu0 %v6731_v0 }
  0xe3   : > { %6416 = vmatpush3.msra.mxu1 %v4536_v58  ;;  %6417 = vmatprep.mubr.msk.f32.mxu1 %vm6732_vm0, %v6731_v0 }
  0xe4   : > { %6425 = vmatprep.subr.mxu1 %v6731_v0  ;;  %6423 = vmatmul.mubr.f32.vlgmr.msra.gmra.mxu0 %v6897_v37 }
  0xe5   : > { %6431 = vmatpush3.msra.mxu0 %v4534_v55  ;;  %6432 = vmatprep.mubr.msk.f32.mxu0 %vm6732_vm0, %v6731_v0 }
  0xe6   : > { %6418 = vmatmul.mubr.msk.f32.vlgmr.msra.gmra.mxu1 %vm326_vm3, %v6893_v35  ;;  %6440 = vmatprep.subr.mxu0 %v6731_v0 }
  0xe7   : > { %6426 = vmatpush3.msra.mxu1 %v7208_v51  ;;  %6427 = vmatprep.mubr.msk.f32.mxu1 %vm6732_vm0, %v6731_v0 }
  0xe8   : > { %6435 = vmatprep.subr.mxu1 %v6731_v0  ;;  %6433 = vmatmul.mubr.msk.f32.vlgmr.msra.gmra.mxu0 %vm326_vm3, %v6893_v35 }
  0xe9   : > { %6441 = vmatpush3.msra.mxu0 %v7246_v57  ;;  %6442 = vmatprep.mubr.msk.f32.mxu0 %vm6732_vm0, %v6731_v0 }
  0xea   : > { %6428 = vmatmul.mubr.f32.vlgmr.msra.gmra.mxu1 %v6900_v38  ;;  %6450 = vmatprep.subr.mxu0 %v6731_v0 }
  0xeb   : > { %6436 = vmatpush3.msra.mxu1 %v7208_v51  ;;  %6437 = vmatprep.mubr.msk.f32.mxu1 %vm6732_vm0, %v6731_v0 }
  0xec   : > { %6445 = vmatprep.subr.mxu1 %v6731_v0  ;;  %6443 = vmatmul.mubr.f32.vlgmr.msra.gmra.mxu0 %v6916_v48 }
  0xed   : > { %6451 = vmatpush3.msra.mxu0 %v4987_v59  ;;  %6452 = vmatprep.mubr.msk.f32.mxu0 %vm6732_vm0, %v6731_v0 }
  0xee   : > { %6438 = vmatmul.mubr.msk.f32.vlgmr.msra.gmra.mxu1 %vm326_vm3, %v6893_v35  ;;  %6460 = vmatprep.subr.mxu0 %v6731_v0 }
  0xef   : > { %6446 = vmatpush3.msra.mxu1 %v4990_v39  ;;  %6447 = vmatprep.mubr.msk.f32.mxu1 %vm6732_vm0, %v6731_v0 }
  0xf0   : > { %6455 = vmatprep.subr.mxu1 %v6731_v0  ;;  %6453 = vmatmul.mubr.f32.vlgmr.msra.gmra.mxu0 %v6897_v37 }
  0xf1   : > { %6461 = vmatpush3.msra.mxu0 %v4988_v60  ;;  %6462 = vmatprep.mubr.msk.f32.mxu0 %vm6732_vm0, %v6731_v0 }
  0xf2   : > { %6448 = vmatmul.mubr.msk.f32.vlgmr.msra.gmra.mxu1 %vm326_vm3, %v6893_v35  ;;  %6470 = vmatprep.subr.mxu0 %v6731_v0 }
  0xf3   : > { %6456 = vmatpush3.msra.mxu1 %v7246_v57  ;;  %6457 = vmatprep.mubr.msk.f32.mxu1 %vm6732_vm0, %v6731_v0 }
  0xf4   : > { %6465 = vmatprep.subr.mxu1 %v6731_v0  ;;  %6463 = vmatmul.mubr.msk.f32.vlgmr.msra.gmra.mxu0 %vm326_vm3, %v6893_v35 }
  0xf5   : > { %6471 = vmatpush3.msk.msra.mxu0 %vm275_vm1, %v5329_v61  ;;  %6472 = vmatprep.mubr.msk.f32.mxu0 %vm6732_vm0, %v6731_v0 }
  0xf6   : > { %6458 = vmatmul.mubr.f32.vlgmr.msra.gmra.mxu1 %v6900_v38  ;;  %6480 = vmatprep.subr.mxu0 %v6731_v0 }
  0xf7   : > { %6466 = vmatpush3.msra.mxu1 %v7246_v57  ;;  %6467 = vmatprep.mubr.msk.f32.mxu1 %vm6732_vm0, %v6731_v0 }
  0xf8   : > { %6475 = vmatprep.subr.mxu1 %v6731_v0  ;;  %6473 = vmatmul.mubr.f32.vlgmr.msra.gmra.mxu0 %v6916_v48 }
  0xf9   : > { %6481 = vmatpush3.msra.mxu0 %v5441_v1  ;;  %6482 = vmatprep.mubr.msk.f32.mxu0 %vm6732_vm0, %v6731_v0 }
  0xfa   : > { %6468 = vmatmul.mubr.msk.f32.vlgmr.msra.gmra.mxu1 %vm326_vm3, %v6893_v35  ;;  %6490 = vmatprep.subr.mxu0 %v6731_v0 }
  0xfb   : > { %6476 = vmatpush3.msra.mxu1 %v5444_v4  ;;  %6477 = vmatprep.mubr.msk.f32.mxu1 %vm6732_vm0, %v6731_v0 }
  0xfc   : > { %6485 = vmatprep.subr.mxu1 %v6731_v0  ;;  %6483 = vmatmul.mubr.f32.vlgmr.msra.gmra.mxu0 %v6897_v37 }
  0xfd   : > { %6491 = vmatpush3.msra.mxu0 %v5442_v2  ;;  %6492 = vmatprep.mubr.msk.f32.mxu0 %vm6732_vm0, %v6731_v0 }
  0xfe   : > { %6478 = vmatmul.mubr.msk.f32.vlgmr.msra.gmra.mxu1 %vm326_vm3, %v6893_v35 }
  0xff   : > { %6486 = vmatpush3.msk.msra.mxu1 %vm275_vm1, %v5329_v61  ;;  %6487 = vmatprep.mubr.msk.f32.mxu1 %vm6732_vm0, %v6731_v0 }
 0x100   : > { %6495 = vmatprep.subr.mxu1 %v6731_v0  ;;  %6493 = vmatmul.mubr.msk.f32.vlgmr.msra.gmra.mxu0 %vm326_vm3, %v6893_v35 }
 0x102   : > { %6488 = vmatmul.mubr.f32.vlgmr.msra.gmra.mxu1 %v6900_v38 }
 0x103   : > { %6496 = vmatpush3.msk.msra.mxu1 %vm275_vm1, %v5329_v61  ;;  %6497 = vmatprep.mubr.msk.f32.mxu1 %vm6732_vm0, %v6731_v0 }
 0x106   : > { %6498 = vmatmul.mubr.msk.f32.vlgmr.msra.gmra.mxu1 %vm326_vm3, %v6893_v35 }
 0x132   : > { %v405_v37 = vpop.f32.mrf.mxu0 }
 0x134   : > { %v6144_v48 = vpop.f32.mrf.mxu0 }
 0x136   : > { %v555_v5 = vpop.f32.mrf.mxu0 }
 0x138   : > { %v6154_v6 = vpop.f32.mrf.mxu0 }
 0x13a   : > { %v481_v7 = vpop.f32.mrf.mxu1 }
 0x13b   : > { %v482_v8 = vadd.f32 %v481_v7, %v405_v37 }
 0x13c   : > { %v6149_v9 = vpop.f32.mrf.mxu1  ;;  %v703_v10 = vpop.f32.mrf.mxu0 }
 0x13d   : > { %v556_v11 = vadd.f32 %v555_v5, %v482_v8 }
 0x13e   : > { %v629_v12 = vpop.f32.mrf.mxu1  ;;  %v6164_v38 = vpop.f32.mrf.mxu0 }
 0x13f   : > { %v630_v13 = vadd.f32 %v629_v12, %v556_v11 }
 0x140   : > { %v6159_v14 = vpop.f32.mrf.mxu1  ;;  %v859_v15 = vpop.f32.mrf.mxu0 }
 0x141   : > { %v704_v16 = vadd.f32 %v703_v10, %v630_v13 }
 0x142   : > { %v775_v0 = vpop.f32.mrf.mxu1  ;;  %v6174_v17 = vpop.f32.mrf.mxu0 }
 0x143   : > { %v776_v18 = vadd.f32 %v775_v0, %v704_v16 }
 0x144   : > { %v6169_v35 = vpop.f32.mrf.mxu1  ;;  %v1009_v19 = vpop.f32.mrf.mxu0 }
 0x145   : > { %780 = vst [vmem:[%s7353_s28] sm:$0xff] %v776_v18 }
 0x146   : > { %v935_v20 = vpop.f32.mrf.mxu1  ;;  %v6184_v21 = vpop.f32.mrf.mxu0 }
 0x147   : > { %v936_v22 = vadd.f32 %v935_v20, %v859_v15 }
 0x148   : > { %v6179_v23 = vpop.f32.mrf.mxu1  ;;  %v1157_v24 = vpop.f32.mrf.mxu0 }
 0x149   : > { %v1010_v25 = vadd.f32 %v1009_v19, %v936_v22 }
 0x14a   : > { %v1083_v26 = vpop.f32.mrf.mxu1  ;;  %v6194_v27 = vpop.f32.mrf.mxu0 }
 0x14b   : > { %v1084_v28 = vadd.f32 %v1083_v26, %v1010_v25 }
 0x14c   : > { %v6189_v29 = vpop.f32.mrf.mxu1  ;;  %v1313_v30 = vpop.f32.mrf.mxu0 }
 0x14d   : > { %v1158_v31 = vadd.f32 %v1157_v24, %v1084_v28 }
 0x14e   : > { %v1229_v32 = vpop.f32.mrf.mxu1  ;;  %v6204_v33 = vpop.f32.mrf.mxu0 }
 0x14f   : > { %v1230_v34 = vadd.f32 %v1229_v32, %v1158_v31 }
 0x150   : > { %v6199_v36 = vpop.f32.mrf.mxu1  ;;  %v1463_v40 = vpop.f32.mrf.mxu0 }
 0x151   : > { %5929 = vst [vmem:[%s7353_s28 + $0x20] sm:$0xff] %v1230_v34 }
 0x152   : > { %v1389_v41 = vpop.f32.mrf.mxu1  ;;  %v6214_v42 = vpop.f32.mrf.mxu0 }
 0x153   : > { %v1390_v43 = vadd.f32 %v1389_v41, %v1313_v30 }
 0x154   : > { %v6209_v45 = vpop.f32.mrf.mxu1  ;;  %v1611_v46 = vpop.f32.mrf.mxu0 }
 0x155   : > { %v1464_v47 = vadd.f32 %v1463_v40, %v1390_v43 }
 0x156   : > { %v1537_v49 = vpop.f32.mrf.mxu1  ;;  %v6224_v50 = vpop.f32.mrf.mxu0 }
 0x157   : > { %v1538_v51 = vadd.f32 %v1537_v49, %v1464_v47 }
 0x158   : > { %v6219_v52 = vpop.f32.mrf.mxu1  ;;  %v1769_v53 = vpop.f32.mrf.mxu0 }
 0x159   : > { %v1612_v54 = vadd.f32 %v1611_v46, %v1538_v51 }
 0x15a   : > { %v1683_v55 = vpop.f32.mrf.mxu1  ;;  %v6234_v44 = vpop.f32.mrf.mxu0 }
 0x15b   : > { %v1684_v56 = vadd.f32 %v1683_v55, %v1612_v54 }
 0x15c   : > { %v6229_v57 = vpop.f32.mrf.mxu1  ;;  %v1919_v58 = vpop.f32.mrf.mxu0 }
 0x15d   : > { %5937 = vst [vmem:[%s7353_s28 + $0x40] sm:$0xff] %v1684_v56 }
 0x15e   : > { %v1845_v59 = vpop.f32.mrf.mxu1  ;;  %v6244_v60 = vpop.f32.mrf.mxu0 }
 0x15f   : > { %v1846_v61 = vadd.f32 %v1845_v59, %v1769_v53 }
 0x160   : > { %v6239_v62 = vpop.f32.mrf.mxu1  ;;  %v2067_v63 = vpop.f32.mrf.mxu0 }
 0x161   : > { %v1920_v39 = vadd.f32 %v1919_v58, %v1846_v61 }
 0x162   : > { %v1993_v1 = vpop.f32.mrf.mxu1  ;;  %v6254_v2 = vpop.f32.mrf.mxu0 }
 0x163   : > { %v1994_v3 = vadd.f32 %v1993_v1, %v1920_v39 }
 0x164   : > { %v6249_v4 = vpop.f32.mrf.mxu1  ;;  %v2223_v37 = vpop.f32.mrf.mxu0 }
 0x165   : > { %v2068_v48 = vadd.f32 %v2067_v63, %v1994_v3 }
 0x166   : > { %v2139_v5 = vpop.f32.mrf.mxu1  ;;  %v6264_v6 = vpop.f32.mrf.mxu0 }
 0x167   : > { %v2140_v7 = vadd.f32 %v2139_v5, %v2068_v48 }
 0x168   : > { %v6259_v8 = vpop.f32.mrf.mxu1  ;;  %v2373_v9 = vpop.f32.mrf.mxu0 }
 0x169   : > { %5942 = vst [vmem:[%s7353_s28 + $0x8] sm:$0xff] %v2140_v7 }
 0x16a   : > { %v2299_v10 = vpop.f32.mrf.mxu1  ;;  %v6274_v11 = vpop.f32.mrf.mxu0 }
 0x16b   : > { %v2300_v12 = vadd.f32 %v2299_v10, %v2223_v37 }
 0x16c   : > { %v6269_v38 = vpop.f32.mrf.mxu1  ;;  %v2521_v13 = vpop.f32.mrf.mxu0 }
 0x16d   : > { %v2374_v14 = vadd.f32 %v2373_v9, %v2300_v12 }
 0x16e   : > { %v2447_v15 = vpop.f32.mrf.mxu1  ;;  %v6284_v16 = vpop.f32.mrf.mxu0 }
 0x16f   : > { %v2448_v0 = vadd.f32 %v2447_v15, %v2374_v14 }
 0x170   : > { %v6279_v17 = vpop.f32.mrf.mxu1  ;;  %v2677_v18 = vpop.f32.mrf.mxu0 }
 0x171   : > { %v2522_v35 = vadd.f32 %v2521_v13, %v2448_v0 }
 0x172   : > { %v2593_v19 = vpop.f32.mrf.mxu1  ;;  %v6294_v20 = vpop.f32.mrf.mxu0 }
 0x173   : > { %v2594_v21 = vadd.f32 %v2593_v19, %v2522_v35 }
 0x174   : > { %v6289_v22 = vpop.f32.mrf.mxu1  ;;  %v2827_v23 = vpop.f32.mrf.mxu0 }
 0x175   : > { %5947 = vst [vmem:[%s7353_s28 + $0x28] sm:$0xff] %v2594_v21 }
 0x176   : > { %v2753_v24 = vpop.f32.mrf.mxu1  ;;  %v6304_v25 = vpop.f32.mrf.mxu0 }
 0x177   : > { %v2754_v26 = vadd.f32 %v2753_v24, %v2677_v18 }
 0x178   : > { %v6299_v27 = vpop.f32.mrf.mxu1  ;;  %v2975_v28 = vpop.f32.mrf.mxu0 }
 0x179   : > { %v2828_v29 = vadd.f32 %v2827_v23, %v2754_v26 }
 0x17a   : > { %v2901_v30 = vpop.f32.mrf.mxu1  ;;  %v6314_v31 = vpop.f32.mrf.mxu0 }
 0x17b   : > { %v2902_v32 = vadd.f32 %v2901_v30, %v2828_v29 }
 0x17c   : > { %v6309_v33 = vpop.f32.mrf.mxu1  ;;  %v3133_v34 = vpop.f32.mrf.mxu0 }
 0x17d   : > { %v2976_v36 = vadd.f32 %v2975_v28, %v2902_v32 }
 0x17e   : > { %v3047_v40 = vpop.f32.mrf.mxu1  ;;  %v6324_v41 = vpop.f32.mrf.mxu0 }
 0x17f   : > { %v3048_v42 = vadd.f32 %v3047_v40, %v2976_v36 }
 0x180   : > { %v6319_v43 = vpop.f32.mrf.mxu1  ;;  %v3283_v45 = vpop.f32.mrf.mxu0 }
 0x181   : > { %5955 = vst [vmem:[%s7353_s28 + $0x48] sm:$0xff] %v3048_v42 }
 0x182   : > { %v3209_v46 = vpop.f32.mrf.mxu1  ;;  %v6334_v47 = vpop.f32.mrf.mxu0 }
 0x183   : > { %v3210_v49 = vadd.f32 %v3209_v46, %v3133_v34 }
 0x184   : > { %v6329_v50 = vpop.f32.mrf.mxu1  ;;  %v3431_v51 = vpop.f32.mrf.mxu0 }
 0x185   : > { %v3284_v52 = vadd.f32 %v3283_v45, %v3210_v49 }
 0x186   : > { %v3357_v53 = vpop.f32.mrf.mxu1  ;;  %v6344_v54 = vpop.f32.mrf.mxu0 }
 0x187   : > { %v3358_v55 = vadd.f32 %v3357_v53, %v3284_v52 }
 0x188   : > { %v6339_v44 = vpop.f32.mrf.mxu1  ;;  %v3587_v56 = vpop.f32.mrf.mxu0 }
 0x189   : > { %v3432_v57 = vadd.f32 %v3431_v51, %v3358_v55 }
 0x18a   : > { %v3503_v58 = vpop.f32.mrf.mxu1  ;;  %v6354_v59 = vpop.f32.mrf.mxu0 }
 0x18b   : > { %v3504_v60 = vadd.f32 %v3503_v58, %v3432_v57 }
 0x18c   : > { %v6349_v61 = vpop.f32.mrf.mxu1  ;;  %v3737_v62 = vpop.f32.mrf.mxu0 }
 0x18d   : > { %5960 = vst [vmem:[%s7353_s28 + $0x10] sm:$0xff] %v3504_v60 }
 0x18e   : > { %v3663_v63 = vpop.f32.mrf.mxu1  ;;  %v6364_v39 = vpop.f32.mrf.mxu0 }
 0x18f   : > { %v3664_v1 = vadd.f32 %v3663_v63, %v3587_v56 }
 0x190   : > { %v6359_v2 = vpop.f32.mrf.mxu1  ;;  %v3885_v3 = vpop.f32.mrf.mxu0 }
 0x191   : > { %v3738_v4 = vadd.f32 %v3737_v62, %v3664_v1 }
 0x192   : > { %v3811_v37 = vpop.f32.mrf.mxu1  ;;  %v6374_v48 = vpop.f32.mrf.mxu0 }
 0x193   : > { %v3812_v5 = vadd.f32 %v3811_v37, %v3738_v4 }
 0x194   : > { %v6369_v6 = vpop.f32.mrf.mxu1  ;;  %v4041_v7 = vpop.f32.mrf.mxu0 }
 0x195   : > { %v3886_v8 = vadd.f32 %v3885_v3, %v3812_v5 }
 0x196   : > { %v3957_v9 = vpop.f32.mrf.mxu1  ;;  %v6384_v10 = vpop.f32.mrf.mxu0 }
 0x197   : > { %v3958_v11 = vadd.f32 %v3957_v9, %v3886_v8 }
 0x198   : > { %v6379_v12 = vpop.f32.mrf.mxu1  ;;  %v4191_v38 = vpop.f32.mrf.mxu0 }
 0x199   : > { %5965 = vst [vmem:[%s7353_s28 + $0x30] sm:$0xff] %v3958_v11 }
 0x19a   : > { %v4117_v13 = vpop.f32.mrf.mxu1  ;;  %v6394_v14 = vpop.f32.mrf.mxu0 }
 0x19b   : > { %v4118_v15 = vadd.f32 %v4117_v13, %v4041_v7 }
 0x19c   : > { %v6389_v16 = vpop.f32.mrf.mxu1  ;;  %v4339_v0 = vpop.f32.mrf.mxu0 }
 0x19d   : > { %v4192_v17 = vadd.f32 %v4191_v38, %v4118_v15 }
 0x19e   : > { %v4265_v18 = vpop.f32.mrf.mxu1  ;;  %v6404_v35 = vpop.f32.mrf.mxu0 }
 0x19f   : > { %v4266_v19 = vadd.f32 %v4265_v18, %v4192_v17 }
 0x1a0   : > { %v6399_v20 = vpop.f32.mrf.mxu1  ;;  %v4497_v21 = vpop.f32.mrf.mxu0 }
 0x1a1   : > { %v4340_v22 = vadd.f32 %v4339_v0, %v4266_v19 }
 0x1a2   : > { %v4411_v23 = vpop.f32.mrf.mxu1  ;;  %v6414_v24 = vpop.f32.mrf.mxu0 }
 0x1a3   : > { %v4412_v25 = vadd.f32 %v4411_v23, %v4340_v22 }
 0x1a4   : > { %v6409_v26 = vpop.f32.mrf.mxu1  ;;  %v4647_v27 = vpop.f32.mrf.mxu0 }
 0x1a5   : > { %5973 = vst [vmem:[%s7353_s28 + $0x50] sm:$0xff] %v4412_v25 }
 0x1a6   : > { %v4573_v28 = vpop.f32.mrf.mxu1  ;;  %v6424_v29 = vpop.f32.mrf.mxu0 }
 0x1a7   : > { %v4574_v30 = vadd.f32 %v4573_v28, %v4497_v21 }
 0x1a8   : > { %v6419_v31 = vpop.f32.mrf.mxu1  ;;  %v4795_v32 = vpop.f32.mrf.mxu0 }
 0x1a9   : > { %v4648_v33 = vadd.f32 %v4647_v27, %v4574_v30 }
 0x1aa   : > { %v4721_v34 = vpop.f32.mrf.mxu1  ;;  %v6434_v36 = vpop.f32.mrf.mxu0 }
 0x1ab   : > { %v4722_v40 = vadd.f32 %v4721_v34, %v4648_v33 }
 0x1ac   : > { %v6429_v41 = vpop.f32.mrf.mxu1  ;;  %v4951_v42 = vpop.f32.mrf.mxu0 }
 0x1ad   : > { %v4796_v43 = vadd.f32 %v4795_v32, %v4722_v40 }
 0x1ae   : > { %v4867_v45 = vpop.f32.mrf.mxu1  ;;  %v6444_v46 = vpop.f32.mrf.mxu0 }
 0x1af   : > { %v4868_v47 = vadd.f32 %v4867_v45, %v4796_v43 }
 0x1b0   : > { %v6439_v49 = vpop.f32.mrf.mxu1  ;;  %v5101_v50 = vpop.f32.mrf.mxu0 }
 0x1b1   : > { %5978 = vst [vmem:[%s7353_s28 + $0x18] sm:$0xff] %v4868_v47 }
 0x1b2   : > { %v5027_v51 = vpop.f32.mrf.mxu1  ;;  %v6454_v52 = vpop.f32.mrf.mxu0 }
 0x1b3   : > { %v5028_v53 = vadd.f32 %v5027_v51, %v4951_v42 }
 0x1b4   : > { %v6449_v54 = vpop.f32.mrf.mxu1  ;;  %v5249_v55 = vpop.f32.mrf.mxu0 }
 0x1b5   : > { %v5102_v44 = vadd.f32 %v5101_v50, %v5028_v53 }
 0x1b6   : > { %v5175_v56 = vpop.f32.mrf.mxu1  ;;  %v6464_v57 = vpop.f32.mrf.mxu0 }
 0x1b7   : > { %v5176_v58 = vadd.f32 %v5175_v56, %v5102_v44 }
 0x1b8   : > { %v6459_v59 = vpop.f32.mrf.mxu1  ;;  %v5405_v60 = vpop.f32.mrf.mxu0 }
 0x1b9   : > { %v5250_v61 = vadd.f32 %v5249_v55, %v5176_v58 }
 0x1ba   : > { %v5321_v62 = vpop.f32.mrf.mxu1  ;;  %v6474_v63 = vpop.f32.mrf.mxu0 }
 0x1bb   : > { %v5322_v39 = vadd.f32 %v5321_v62, %v5250_v61 }
 0x1bc   : > { %v6469_v1 = vpop.f32.mrf.mxu1  ;;  %v5555_v2 = vpop.f32.mrf.mxu0 }
 0x1bd   : > { %5983 = vst [vmem:[%s7353_s28 + $0x38] sm:$0xff] %v5322_v39 }
 0x1be   : > { %v5481_v3 = vpop.f32.mrf.mxu1  ;;  %v6484_v4 = vpop.f32.mrf.mxu0 }
 0x1bf   : > { %v5482_v37 = vadd.f32 %v5481_v3, %v5405_v60 }
 0x1c0   : > { %v6479_v48 = vpop.f32.mrf.mxu1  ;;  %v5703_v5 = vpop.f32.mrf.mxu0 }
 0x1c1   : > { %v5556_v6 = vadd.f32 %v5555_v2, %v5482_v37 }
 0x1c2   : > { %v5629_v7 = vpop.f32.mrf.mxu1  ;;  %v6494_v8 = vpop.f32.mrf.mxu0 }
 0x1c3   : > { %v5630_v9 = vadd.f32 %v5629_v7, %v5556_v6 }
 0x1c4   : > { %v6489_v10 = vpop.f32.mrf.mxu1 }
 0x1c5   : > { %v5704_v11 = vadd.f32 %v5703_v5, %v5630_v9 }
 0x1c6   : > { %v5775_v12 = vpop.f32.mrf.mxu1 }
 0x1c7   : > { %v5776_v38 = vadd.f32 %v5775_v12, %v5704_v11 }
 0x1c8   : > { %v6499_v13 = vpop.f32.mrf.mxu1 }
 0x1c9   : > { %5991 = vst [vmem:[%s7353_s28 + $0x58] sm:$0xff] %v5776_v38 }
 0x1ca   : > { %6654 = shalt.err (!%p6651_p7)
}
 0x1cb   : > { %s6655_s18 = scalar_lea.hbm %s7371_s15, 1536  ;;  %s6659_s5 = scalar_lea.hbm %s7424_s2, 3072 }
 0x1cc   : > { %p6656_p1 = scmp.ne.s32.totalorder %s7371_s15, %s6655_s18  ;;  %p6660_p3 = scmp.lt.s32.totalorder %s7371_s15, %s7424_s2 }
 0x1cd   : > { %p6661_p8 = scmp.lt.s32.totalorder %s6659_s5, %s6655_s18 }
 0x1ce   : > { %p6657_p10 = pnand %p6656_p1, %p6802_p9 }
 0x1cf   : > { %p6662_p0 = por %p6661_p8, %p6660_p3 }
 0x1d0   : > { %p6658_p13 = pneg %p6657_p10 }
 0x1d2   : > { %p6663_p2 = pnand %p6662_p0, %p6658_p13 }
 0x1d4   : > { %6666 = shalt.err (!%p6663_p2)
}
 0x1d5   : > { %s6734_s21 = smov 128   ;;  %s6735_s28 = smov 8  }
 0x1d6   : > { %6506 = dma.vmem_to_hbm [thread:$0]  (%p6802_p9), %s7373_s3, 1536, %s7371_s15, %s5782_s16, %s6734_s21, %s6734_s21, %s6735_s28  }
 0x1d7 PF: > { %s5812_s29 = sand.u32 1, %s6705_s9   ;;  %p6516_p5 = pnand %p5912_p12, %p6809_p11 }
 0x1d8   : > { %s5813_s7 = scalar_lea.sflag [#allocation4], %s5812_s29 }
 0x1d9   : > { %p6517_p6 = pneg %p6516_p5 }
 0x1db   : > { %6700 = dma.done.wait (%p6517_p6), %s5813_s7, 1536  }
 0x1dc   : > { %6702 = vsyncadd (%p6517_p6), %s5813_s7, 4294965760  ;;  %s21_s14 = sadd.s32 1, %s6725_s14   ;;  %s7431_s9 = smov %s6709_s10 }
 0x1dd   : > { %p18_p4 = scmp.ge.s32.totalorder %s21_s14, 4   ;;  %s7432_s10 = smov %s6713_s11 }
 0x1de   : > { %s7433_s11 = smov %s6807_s23  ;;  %s7434_s12 = smov %s6721_s13 }
 0x1df   : > { %s7435_s13 = smov %s7437_s17  ;;  %20 = sbr.rel (!%p18_p4) target bundleno = 8 (0x8), region = 101 }
 0x1e4   :  { %5818 = vsyncpa [#allocation3], 1 }
 0x1e5   :  { %5820 = vsyncpa [#allocation3 + $0x1], 1 }
 0x1e6   :  { %5821 = vsyncpa [#allocation6], 1 }
 0x1e7   :  { %5823 = vsyncpa [#allocation6 + $0x1], 1 }
 0x1e8   :  { %5824 = vsyncpa [#allocation4], 1 }
 0x1e9   :  { %5826 = vsyncpa [#allocation4 + $0x1], 1 }

</bundles_post_ra>
